<compile_context>
chip_gen: v5e
topology: v5e:2x2
jax: 0.10.0
libtpu: 0.0.40
codegen_flags: <defaults>
</compile_context>

<pallas_src>
import math

import jax
import jax.numpy as jnp
from jax.experimental import pallas as pl
from jax.experimental.pallas import tpu as pltpu


# ----------------------------------------------------------------------------
# Pallas kernel: one GatedGraphConv layer iteration
#   inner loop : adjacency-tile @ node-state-tile accumulation (bf16 -> f32)
#   epilogue   : per-layer linear + GRUCell(agg, x)  (PyTorch gate order r, z, n)
# ----------------------------------------------------------------------------
def _ggc_layer_kernel(x_bf_ref, adj_ref, x_ref, w_ref, wih_ref, whh_ref,
                      bih_ref, bhh_ref, out_ref, acc_ref):
    k = pl.program_id(1)

    @pl.when(k == 0)
    def _init():
        acc_ref[...] = jnp.zeros_like(acc_ref)

    # Dominant work: (TN, TK) bf16 adjacency tile @ (TK, H) bf16 node states.
    acc_ref[...] += jnp.dot(adj_ref[...], x_bf_ref[...],
                            preferred_element_type=jnp.float32)

    @pl.when(k == pl.num_programs(1) - 1)
    def _epilogue():
        x = x_ref[...]                                     # (TN, H) f32 (hidden state)
        # Per-layer linear folded via associativity: A @ (x W) == (A @ x) @ W.
        agg = jnp.dot(acc_ref[...], w_ref[...],
                      preferred_element_type=jnp.float32)  # (TN, H) f32

        def gate(g):
            gi = jnp.dot(agg, wih_ref[g],
                         preferred_element_type=jnp.float32) + bih_ref[g]
            gh = jnp.dot(x, whh_ref[g],
                         preferred_element_type=jnp.float32) + bhh_ref[g]
            return gi, gh

        gi_r, gh_r = gate(0)
        gi_z, gh_z = gate(1)
        gi_n, gh_n = gate(2)

        r = jax.nn.sigmoid(gi_r + gh_r)
        z = jax.nn.sigmoid(gi_z + gh_z)
        n = jnp.tanh(gi_n + r * gh_n)
        out_ref[...] = (1.0 - z) * n + z * x


def ggc_layer_step(x_f32, x_bf16, adj_bf16, w_l, wih, whh, bih, bhh,
                   *, tile_n=256, tile_k=256):
    """One GatedGraphConv layer iteration via a tiled Pallas kernel."""
    Np, H = x_f32.shape
    assert H % 128 == 0, "pad hidden_dim to a multiple of 128 (e.g. 150 -> 256)"
    assert Np % tile_n == 0 and Np % tile_k == 0, "pad N to the tile grid"
    grid = (Np // tile_n, Np // tile_k)

    # Advisory cost estimate (lets XLA overlap the sequential layer calls).
    flops = 2 * Np * Np * H + 2 * Np * H * H * 7          # agg + W_l + 6 GRU matmuls
    bytes_accessed = (Np * Np * 2                          # adjacency (bf16)
                      + Np * H * (2 + 4 + 4)               # x_bf16 + x_f32 + out
                      + (7 * H * H + 6 * H) * 4)           # weights + biases
    cost = pl.CostEstimate(flops=flops, transcendentals=3 * Np * H,
                           bytes_accessed=bytes_accessed)

    return pl.pallas_call(
        _ggc_layer_kernel,
        out_shape=jax.ShapeDtypeStruct((Np, H), jnp.float32),
        grid=grid,
        in_specs=[
            pl.BlockSpec((tile_k, H), lambda i, k: (k, 0)),       # x (bf16), agg side
            pl.BlockSpec((tile_n, tile_k), lambda i, k: (i, k)),  # adjacency (bf16)
            pl.BlockSpec((tile_n, H), lambda i, k: (i, 0)),       # x (f32), GRU side
            pl.BlockSpec((H, H), lambda i, k: (0, 0)),            # W_l
            pl.BlockSpec((3, H, H), lambda i, k: (0, 0, 0)),      # W_ih^T per gate
            pl.BlockSpec((3, H, H), lambda i, k: (0, 0, 0)),      # W_hh^T per gate
            pl.BlockSpec((3, 1, H), lambda i, k: (0, 0, 0)),      # b_ih per gate
            pl.BlockSpec((3, 1, H), lambda i, k: (0, 0, 0)),      # b_hh per gate
        ],
        out_specs=pl.BlockSpec((tile_n, H), lambda i, k: (i, 0)),
        scratch_shapes=[pltpu.VMEM((tile_n, H), jnp.float32)],    # agg accumulator
        input_output_aliases={2: 0},   # new node state overwrites the old x buffer
        compiler_params=pltpu.CompilerParams(
            dimension_semantics=("parallel", "arbitrary"),
            vmem_limit_bytes=32 * 1024 * 1024),
        cost_estimate=cost,
    )(x_bf16, adj_bf16, x_f32, w_l, wih, whh, bih, bhh)


# ----------------------------------------------------------------------------
# GatedGraphConv / GAE glue (plain JAX; hot path is the kernel above)
# ----------------------------------------------------------------------------
def gated_graph_conv(params, x, adj_bf16, hidden_dim, num_layers,
                     tile_n, tile_k):
    _, in_dim = x.shape
    if in_dim > hidden_dim:
        raise ValueError("input feature dim larger than out_channels")
    if in_dim < hidden_dim:
        # PyG pads input features with zeros up to out_channels.
        x = jnp.pad(x, ((0, 0), (0, hidden_dim - in_dim)))
    for l in range(num_layers):
        x = ggc_layer_step(x, x.astype(jnp.bfloat16), adj_bf16,
                           params["weight"][l], params["wih"], params["whh"],
                           params["bih"], params["bhh"],
                           tile_n=tile_n, tile_k=tile_k)
    return x


def build_dense_graph(x_in, edge_index, edge_attr, tile_n, tile_k):
    """Densify edges into A[dst, src] = w, padded up to the tile grid."""
    N = x_in.shape[0]
    tile = math.lcm(tile_n, tile_k)
    n_pad = ((N + tile - 1) // tile) * tile
    src, dst = edge_index[0], edge_index[1]
    w = jnp.reshape(edge_attr, (-1,)).astype(jnp.float32)
    adj = jnp.zeros((n_pad, n_pad), jnp.float32).at[dst, src].add(w)
    x_pad = jnp.pad(x_in.astype(jnp.float32), ((0, n_pad - N), (0, 0)))
    return x_pad, adj.astype(jnp.bfloat16), N


def gae_forward(enc_params, dec_params, x_in, edge_index, edge_attr,
                hidden_dim, ggc_layers=3, tile_n=256, tile_k=256):
    x_pad, adj_bf, N = build_dense_graph(x_in, edge_index, edge_attr,
                                         tile_n, tile_k)
    x = gated_graph_conv(enc_params, x_pad, adj_bf, hidden_dim, ggc_layers,
                         tile_n, tile_k)
    recon = gated_graph_conv(dec_params, x, adj_bf, hidden_dim, ggc_layers,
                             tile_n, tile_k)
    return x[:N], recon[:N]


def init_ggc_params(key, hidden_dim, num_layers):
    k1, k2, k3, k4, k5 = jax.random.split(key, 5)
    scale = 1.0 / math.sqrt(hidden_dim)
    u = lambda k, shape: jax.random.uniform(k, shape, jnp.float32, -scale, scale)
    return {
        "weight": u(k1, (num_layers, hidden_dim, hidden_dim)),   # per-layer W_l
        # GRUCell weights pre-transposed AND pre-split per gate (r, z, n) so the
        # kernel's gate matmuls / bias adds are 128-lane aligned.
        "wih": u(k2, (3, hidden_dim, hidden_dim)),
        "whh": u(k3, (3, hidden_dim, hidden_dim)),
        "bih": u(k4, (3, 1, hidden_dim)),
        "bhh": u(k5, (3, 1, hidden_dim)),
    }


# ----------------------------------------------------------------------------
# Plain-JAX reference (matched precision) for validation
# ----------------------------------------------------------------------------
def _ggc_reference(params, x, adj_bf, hidden_dim, num_layers):
    _, in_dim = x.shape
    if in_dim < hidden_dim:
        x = jnp.pad(x, ((0, 0), (0, hidden_dim - in_dim)))
    for l in range(num_layers):
        ax = jnp.dot(adj_bf, x.astype(jnp.bfloat16),
                     preferred_element_type=jnp.float32)
        agg = ax @ params["weight"][l]
        gi = [agg @ params["wih"][g] + params["bih"][g] for g in range(3)]
        gh = [x @ params["whh"][g] + params["bhh"][g] for g in range(3)]
        r = jax.nn.sigmoid(gi[0] + gh[0])
        z = jax.nn.sigmoid(gi[1] + gh[1])
        n = jnp.tanh(gi[2] + r * gh[2])
        x = (1.0 - z) * n + z * x
    return x


if __name__ == "__main__":
    # Small synthetic graph consistent with the module's forward signature.
    N = 200          # nodes (padded to 256 inside)
    IN_DIM = 8       # input node-feature dim (zero-padded up to hidden)
    HIDDEN = 128     # lane-aligned hidden dim (production 150 -> pad to 256)
    E = 600          # edges
    GGC_LAYERS = 3   # GatedGraphConv(num_layers=3) in encoder and decoder
    TILE_N = 128     # output-row tile
    TILE_K = 128     # adjacency-column reduction tile

    key = jax.random.PRNGKey(0)
    kx, ke, kw, kenc, kdec = jax.random.split(key, 5)

    x_in = jax.random.normal(kx, (N, IN_DIM), jnp.float32)
    edge_index = jax.random.randint(ke, (2, E), 0, N, dtype=jnp.int32)
    edge_attr = jax.random.uniform(kw, (E, 1), jnp.float32)

    enc_params = init_ggc_params(kenc, HIDDEN, GGC_LAYERS)
    dec_params = init_ggc_params(kdec, HIDDEN, GGC_LAYERS)

    fwd = jax.jit(gae_forward,
                  static_argnames=("hidden_dim", "ggc_layers", "tile_n", "tile_k"))
    x, recon_x = fwd(enc_params, dec_params, x_in, edge_index, edge_attr,
                     hidden_dim=HIDDEN, ggc_layers=GGC_LAYERS,
                     tile_n=TILE_N, tile_k=TILE_K)
    jax.block_until_ready((x, recon_x))

    assert x.shape == (N, HIDDEN) and recon_x.shape == (N, HIDDEN)
    assert bool(jnp.all(jnp.isfinite(x))) and bool(jnp.all(jnp.isfinite(recon_x)))

    # Validate against a plain-JAX reference with matched bf16/f32 precision.
    x_pad, adj_bf, _ = build_dense_graph(x_in, edge_index, edge_attr,
                                         TILE_N, TILE_K)
    x_ref = _ggc_reference(enc_params, x_pad, adj_bf, HIDDEN, GGC_LAYERS)
    r_ref = _ggc_reference(dec_params, x_ref, adj_bf, HIDDEN, GGC_LAYERS)
    assert jnp.allclose(x, x_ref[:N], atol=2e-2, rtol=2e-2), \
        float(jnp.max(jnp.abs(x - x_ref[:N])))
    assert jnp.allclose(recon_x, r_ref[:N], atol=2e-2, rtol=2e-2), \
        float(jnp.max(jnp.abs(recon_x - r_ref[:N])))

    print("KERNEL_OK")
</pallas_src>

<mosaic_0001>
module attributes {stable_mosaic.version = 11 : i64} {
  func.func @_ggc_layer_kernel(%arg0: i32, %arg1: i32, %arg2: memref<128x128xbf16, #tpu.memory_space<vmem>>, %arg3: memref<128x128xbf16, #tpu.memory_space<vmem>>, %arg4: memref<128x128xf32, #tpu.memory_space<vmem>>, %arg5: memref<128x128xf32, #tpu.memory_space<vmem>>, %arg6: memref<3x128x128xf32, #tpu.memory_space<vmem>>, %arg7: memref<3x128x128xf32, #tpu.memory_space<vmem>>, %arg8: memref<3x1x128xf32, #tpu.memory_space<vmem>>, %arg9: memref<3x1x128xf32, #tpu.memory_space<vmem>>, %arg10: memref<128x128xf32, #tpu.memory_space<vmem>>, %arg11: memref<128x128xf32, #tpu.memory_space<vmem>>) attributes {dimension_semantics = [#tpu.dimension_semantics<parallel>, #tpu.dimension_semantics<arbitrary>], iteration_bounds = array<i64: 2, 2>, scalar_prefetch = 0 : i64, scratch_operands = 1 : i64, tpu.core_type = #tpu.core_type<tc>, window_params = [{transform_indices = @transform_0, window_bounds = array<i64: 128, 128>}, {transform_indices = @transform_1, window_bounds = array<i64: 128, 128>}, {transform_indices = @transform_2, window_bounds = array<i64: 128, 128>}, {pipeline_mode = #tpu.pipeline_mode<synchronous>, transform_indices = @transform_3, window_bounds = array<i64: 128, 128>}, {pipeline_mode = #tpu.pipeline_mode<synchronous>, transform_indices = @transform_4, window_bounds = array<i64: 3, 128, 128>}, {pipeline_mode = #tpu.pipeline_mode<synchronous>, transform_indices = @transform_5, window_bounds = array<i64: 3, 128, 128>}, {pipeline_mode = #tpu.pipeline_mode<synchronous>, transform_indices = @transform_6, window_bounds = array<i64: 3, 1, 128>}, {pipeline_mode = #tpu.pipeline_mode<synchronous>, transform_indices = @transform_7, window_bounds = array<i64: 3, 1, 128>}, {transform_indices = @transform_8, window_bounds = array<i64: 128, 128>}]} {
    %c0_i32 = arith.constant 0 : i32
    %0 = arith.cmpi eq, %arg1, %c0_i32 : i32
    %1 = arith.extui %0 : i1 to i32
    %c0_i32_0 = arith.constant 0 : i32
    %2 = arith.cmpi ne, %1, %c0_i32_0 : i32
    scf.if %2 {
      %cst_9 = arith.constant 0.000000e+00 : f32
      %12 = vector.broadcast %cst_9 : f32 to vector<128x128xf32>
      %c0_10 = arith.constant 0 : index
      %c0_11 = arith.constant 0 : index
      %13 = vector.load %arg11[%c0_10, %c0_11] : memref<128x128xf32, #tpu.memory_space<vmem>>, vector<128x128xf32>
      tpu.vector_store %arg11[%c0_10, %c0_11], %12 {strides = array<i32>} : memref<128x128xf32, #tpu.memory_space<vmem>>, vector<128x128xf32>,
    } else {
    }
    %c0 = arith.constant 0 : index
    %c0_1 = arith.constant 0 : index
    %3 = vector.load %arg11[%c0, %c0_1] : memref<128x128xf32, #tpu.memory_space<vmem>>, vector<128x128xf32>
    %c0_2 = arith.constant 0 : index
    %c0_3 = arith.constant 0 : index
    %4 = vector.load %arg3[%c0_2, %c0_3] : memref<128x128xbf16, #tpu.memory_space<vmem>>, vector<128x128xbf16>
    %c0_4 = arith.constant 0 : index
    %c0_5 = arith.constant 0 : index
    %5 = vector.load %arg2[%c0_4, %c0_5] : memref<128x128xbf16, #tpu.memory_space<vmem>>, vector<128x128xbf16>
    %cst = arith.constant dense<0.000000e+00> : vector<128x128xf32>
    %6 = tpu.matmul %4, %5, %cst {dimension_numbers = #tpu.dot_dimension_numbers<[1], [0], [0], [1], [0, 0, 1, 1], [], []>} : vector<128x128xbf16>, vector<128x128xbf16>, vector<128x128xf32> -> vector<128x128xf32>
    %7 = arith.addf %3, %6 : vector<128x128xf32>
    %c0_6 = arith.constant 0 : index
    %c0_7 = arith.constant 0 : index
    %8 = vector.load %arg11[%c0_6, %c0_7] : memref<128x128xf32, #tpu.memory_space<vmem>>, vector<128x128xf32>
    tpu.vector_store %arg11[%c0_6, %c0_7], %7 {strides = array<i32>} : memref<128x128xf32, #tpu.memory_space<vmem>>, vector<128x128xf32>,
    %c1_i32 = arith.constant 1 : i32
    %9 = arith.cmpi eq, %arg1, %c1_i32 : i32
    %10 = arith.extui %9 : i1 to i32
    %c0_i32_8 = arith.constant 0 : i32
    %11 = arith.cmpi ne, %10, %c0_i32_8 : i32
    scf.if %11 {
      %c0_9 = arith.constant 0 : index
      %c0_10 = arith.constant 0 : index
      %12 = vector.load %arg4[%c0_9, %c0_10] : memref<128x128xf32, #tpu.memory_space<vmem>>, vector<128x128xf32>
      %c0_11 = arith.constant 0 : index
      %c0_12 = arith.constant 0 : index
      %13 = vector.load %arg11[%c0_11, %c0_12] : memref<128x128xf32, #tpu.memory_space<vmem>>, vector<128x128xf32>
      %c0_13 = arith.constant 0 : index
      %c0_14 = arith.constant 0 : index
      %14 = vector.load %arg5[%c0_13, %c0_14] : memref<128x128xf32, #tpu.memory_space<vmem>>, vector<128x128xf32>
      %cst_15 = arith.constant dense<0.000000e+00> : vector<128x128xf32>
      %15 = tpu.matmul %13, %14, %cst_15 {dimension_numbers = #tpu.dot_dimension_numbers<[1], [0], [0], [1], [0, 0, 1, 1], [], []>} : vector<128x128xf32>, vector<128x128xf32>, vector<128x128xf32> -> vector<128x128xf32>
      %c0_16 = arith.constant 0 : index
      %c0_17 = arith.constant 0 : index
      %c0_18 = arith.constant 0 : index
      %16 = vector.load %arg6[%c0_16, %c0_17, %c0_18] : memref<3x128x128xf32, #tpu.memory_space<vmem>>, vector<1x128x128xf32>
      %17 = vector.shape_cast %16 : vector<1x128x128xf32> to vector<128x128xf32>
      %cst_19 = arith.constant dense<0.000000e+00> : vector<128x128xf32>
      %18 = tpu.matmul %15, %17, %cst_19 {dimension_numbers = #tpu.dot_dimension_numbers<[1], [0], [0], [1], [0, 0, 1, 1], [], []>} : vector<128x128xf32>, vector<128x128xf32>, vector<128x128xf32> -> vector<128x128xf32>
      %c0_20 = arith.constant 0 : index
      %c0_21 = arith.constant 0 : index
      %c0_22 = arith.constant 0 : index
      %19 = vector.load %arg8[%c0_20, %c0_21, %c0_22] : memref<3x1x128xf32, #tpu.memory_space<vmem>>, vector<1x1x128xf32>
      %20 = vector.shape_cast %19 : vector<1x1x128xf32> to vector<1x128xf32>
      %21 = vector.broadcast %20 : vector<1x128xf32> to vector<128x128xf32>
      %22 = arith.addf %18, %21 : vector<128x128xf32>
      %c0_23 = arith.constant 0 : index
      %c0_24 = arith.constant 0 : index
      %c0_25 = arith.constant 0 : index
      %23 = vector.load %arg7[%c0_23, %c0_24, %c0_25] : memref<3x128x128xf32, #tpu.memory_space<vmem>>, vector<1x128x128xf32>
      %24 = vector.shape_cast %23 : vector<1x128x128xf32> to vector<128x128xf32>
      %cst_26 = arith.constant dense<0.000000e+00> : vector<128x128xf32>
      %25 = tpu.matmul %12, %24, %cst_26 {dimension_numbers = #tpu.dot_dimension_numbers<[1], [0], [0], [1], [0, 0, 1, 1], [], []>} : vector<128x128xf32>, vector<128x128xf32>, vector<128x128xf32> -> vector<128x128xf32>
      %c0_27 = arith.constant 0 : index
      %c0_28 = arith.constant 0 : index
      %c0_29 = arith.constant 0 : index
      %26 = vector.load %arg9[%c0_27, %c0_28, %c0_29] : memref<3x1x128xf32, #tpu.memory_space<vmem>>, vector<1x1x128xf32>
      %27 = vector.shape_cast %26 : vector<1x1x128xf32> to vector<1x128xf32>
      %28 = vector.broadcast %27 : vector<1x128xf32> to vector<128x128xf32>
      %29 = arith.addf %25, %28 : vector<128x128xf32>
      %c1 = arith.constant 1 : index
      %c0_30 = arith.constant 0 : index
      %c0_31 = arith.constant 0 : index
      %30 = vector.load %arg6[%c1, %c0_30, %c0_31] : memref<3x128x128xf32, #tpu.memory_space<vmem>>, vector<1x128x128xf32>
      %31 = vector.shape_cast %30 : vector<1x128x128xf32> to vector<128x128xf32>
      %cst_32 = arith.constant dense<0.000000e+00> : vector<128x128xf32>
      %32 = tpu.matmul %15, %31, %cst_32 {dimension_numbers = #tpu.dot_dimension_numbers<[1], [0], [0], [1], [0, 0, 1, 1], [], []>} : vector<128x128xf32>, vector<128x128xf32>, vector<128x128xf32> -> vector<128x128xf32>
      %c1_33 = arith.constant 1 : index
      %c0_34 = arith.constant 0 : index
      %c0_35 = arith.constant 0 : index
      %33 = vector.load %arg8[%c1_33, %c0_34, %c0_35] : memref<3x1x128xf32, #tpu.memory_space<vmem>>, vector<1x1x128xf32>
      %34 = vector.shape_cast %33 : vector<1x1x128xf32> to vector<1x128xf32>
      %35 = vector.broadcast %34 : vector<1x128xf32> to vector<128x128xf32>
      %36 = arith.addf %32, %35 : vector<128x128xf32>
      %c1_36 = arith.constant 1 : index
      %c0_37 = arith.constant 0 : index
      %c0_38 = arith.constant 0 : index
      %37 = vector.load %arg7[%c1_36, %c0_37, %c0_38] : memref<3x128x128xf32, #tpu.memory_space<vmem>>, vector<1x128x128xf32>
      %38 = vector.shape_cast %37 : vector<1x128x128xf32> to vector<128x128xf32>
      %cst_39 = arith.constant dense<0.000000e+00> : vector<128x128xf32>
      %39 = tpu.matmul %12, %38, %cst_39 {dimension_numbers = #tpu.dot_dimension_numbers<[1], [0], [0], [1], [0, 0, 1, 1], [], []>} : vector<128x128xf32>, vector<128x128xf32>, vector<128x128xf32> -> vector<128x128xf32>
      %c1_40 = arith.constant 1 : index
      %c0_41 = arith.constant 0 : index
      %c0_42 = arith.constant 0 : index
      %40 = vector.load %arg9[%c1_40, %c0_41, %c0_42] : memref<3x1x128xf32, #tpu.memory_space<vmem>>, vector<1x1x128xf32>
      %41 = vector.shape_cast %40 : vector<1x1x128xf32> to vector<1x128xf32>
      %42 = vector.broadcast %41 : vector<1x128xf32> to vector<128x128xf32>
      %43 = arith.addf %39, %42 : vector<128x128xf32>
      %c2 = arith.constant 2 : index
      %c0_43 = arith.constant 0 : index
      %c0_44 = arith.constant 0 : index
      %44 = vector.load %arg6[%c2, %c0_43, %c0_44] : memref<3x128x128xf32, #tpu.memory_space<vmem>>, vector<1x128x128xf32>
      %45 = vector.shape_cast %44 : vector<1x128x128xf32> to vector<128x128xf32>
      %cst_45 = arith.constant dense<0.000000e+00> : vector<128x128xf32>
      %46 = tpu.matmul %15, %45, %cst_45 {dimension_numbers = #tpu.dot_dimension_numbers<[1], [0], [0], [1], [0, 0, 1, 1], [], []>} : vector<128x128xf32>, vector<128x128xf32>, vector<128x128xf32> -> vector<128x128xf32>
      %c2_46 = arith.constant 2 : index
      %c0_47 = arith.constant 0 : index
      %c0_48 = arith.constant 0 : index
      %47 = vector.load %arg8[%c2_46, %c0_47, %c0_48] : memref<3x1x128xf32, #tpu.memory_space<vmem>>, vector<1x1x128xf32>
      %48 = vector.shape_cast %47 : vector<1x1x128xf32> to vector<1x128xf32>
      %49 = vector.broadcast %48 : vector<1x128xf32> to vector<128x128xf32>
      %50 = arith.addf %46, %49 : vector<128x128xf32>
      %c2_49 = arith.constant 2 : index
      %c0_50 = arith.constant 0 : index
      %c0_51 = arith.constant 0 : index
      %51 = vector.load %arg7[%c2_49, %c0_50, %c0_51] : memref<3x128x128xf32, #tpu.memory_space<vmem>>, vector<1x128x128xf32>
      %52 = vector.shape_cast %51 : vector<1x128x128xf32> to vector<128x128xf32>
      %cst_52 = arith.constant dense<0.000000e+00> : vector<128x128xf32>
      %53 = tpu.matmul %12, %52, %cst_52 {dimension_numbers = #tpu.dot_dimension_numbers<[1], [0], [0], [1], [0, 0, 1, 1], [], []>} : vector<128x128xf32>, vector<128x128xf32>, vector<128x128xf32> -> vector<128x128xf32>
      %c2_53 = arith.constant 2 : index
      %c0_54 = arith.constant 0 : index
      %c0_55 = arith.constant 0 : index
      %54 = vector.load %arg9[%c2_53, %c0_54, %c0_55] : memref<3x1x128xf32, #tpu.memory_space<vmem>>, vector<1x1x128xf32>
      %55 = vector.shape_cast %54 : vector<1x1x128xf32> to vector<1x128xf32>
      %56 = vector.broadcast %55 : vector<1x128xf32> to vector<128x128xf32>
      %57 = arith.addf %53, %56 : vector<128x128xf32>
      %58 = arith.addf %22, %29 : vector<128x128xf32>
      %59 = arith.negf %58 : vector<128x128xf32>
      %60 = math.exp %59 : vector<128x128xf32>
      %cst_56 = arith.constant 1.000000e+00 : f32
      %61 = vector.broadcast %cst_56 : f32 to vector<128x128xf32>
      %62 = arith.addf %61, %60 : vector<128x128xf32>
      %63 = arith.divf %61, %62 : vector<128x128xf32>
      %64 = arith.addf %36, %43 : vector<128x128xf32>
      %65 = arith.negf %64 : vector<128x128xf32>
      %66 = math.exp %65 : vector<128x128xf32>
      %cst_57 = arith.constant 1.000000e+00 : f32
      %67 = vector.broadcast %cst_57 : f32 to vector<128x128xf32>
      %68 = arith.addf %67, %66 : vector<128x128xf32>
      %69 = arith.divf %67, %68 : vector<128x128xf32>
      %70 = arith.mulf %63, %57 : vector<128x128xf32>
      %71 = arith.addf %50, %70 : vector<128x128xf32>
      %72 = math.tanh %71 : vector<128x128xf32>
      %cst_58 = arith.constant 1.000000e+00 : f32
      %73 = vector.broadcast %cst_58 : f32 to vector<128x128xf32>
      %74 = arith.subf %73, %69 : vector<128x128xf32>
      %75 = arith.mulf %74, %72 : vector<128x128xf32>
      %76 = arith.mulf %69, %12 : vector<128x128xf32>
      %77 = arith.addf %75, %76 : vector<128x128xf32>
      %c0_59 = arith.constant 0 : index
      %c0_60 = arith.constant 0 : index
      %78 = vector.load %arg10[%c0_59, %c0_60] : memref<128x128xf32, #tpu.memory_space<vmem>>, vector<128x128xf32>
      tpu.vector_store %arg10[%c0_59, %c0_60], %77 {strides = array<i32>} : memref<128x128xf32, #tpu.memory_space<vmem>>, vector<128x128xf32>,
    } else {
    }
    return
  }
  func.func @transform_0(%arg0: i32, %arg1: i32) -> (i32, i32) {
    %c0_i32 = arith.constant 0 : i32
    %c0_i32_0 = arith.constant 0 : i32
    return %arg1, %c0_i32 : i32, i32
  }
  func.func @transform_1(%arg0: i32, %arg1: i32) -> (i32, i32) {
    %c0_i32 = arith.constant 0 : i32
    return %arg0, %arg1 : i32, i32
  }
  func.func @transform_2(%arg0: i32, %arg1: i32) -> (i32, i32) {
    %c0_i32 = arith.constant 0 : i32
    %c0_i32_0 = arith.constant 0 : i32
    return %arg0, %c0_i32 : i32, i32
  }
  func.func @transform_3(%arg0: i32, %arg1: i32) -> (i32, i32) {
    %c0_i32 = arith.constant 0 : i32
    %c0_i32_0 = arith.constant 0 : i32
    %c0_i32_1 = arith.constant 0 : i32
    return %c0_i32, %c0_i32_0 : i32, i32
  }
  func.func @transform_4(%arg0: i32, %arg1: i32) -> (i32, i32, i32) {
    %c0_i32 = arith.constant 0 : i32
    %c0_i32_0 = arith.constant 0 : i32
    %c0_i32_1 = arith.constant 0 : i32
    %c0_i32_2 = arith.constant 0 : i32
    return %c0_i32, %c0_i32_0, %c0_i32_1 : i32, i32, i32
  }
  func.func @transform_5(%arg0: i32, %arg1: i32) -> (i32, i32, i32) {
    %c0_i32 = arith.constant 0 : i32
    %c0_i32_0 = arith.constant 0 : i32
    %c0_i32_1 = arith.constant 0 : i32
    %c0_i32_2 = arith.constant 0 : i32
    return %c0_i32, %c0_i32_0, %c0_i32_1 : i32, i32, i32
  }
  func.func @transform_6(%arg0: i32, %arg1: i32) -> (i32, i32, i32) {
    %c0_i32 = arith.constant 0 : i32
    %c0_i32_0 = arith.constant 0 : i32
    %c0_i32_1 = arith.constant 0 : i32
    %c0_i32_2 = arith.constant 0 : i32
    return %c0_i32, %c0_i32_0, %c0_i32_1 : i32, i32, i32
  }
  func.func @transform_7(%arg0: i32, %arg1: i32) -> (i32, i32, i32) {
    %c0_i32 = arith.constant 0 : i32
    %c0_i32_0 = arith.constant 0 : i32
    %c0_i32_1 = arith.constant 0 : i32
    %c0_i32_2 = arith.constant 0 : i32
    return %c0_i32, %c0_i32_0, %c0_i32_1 : i32, i32, i32
  }
  func.func @transform_8(%arg0: i32, %arg1: i32) -> (i32, i32) {
    %c0_i32 = arith.constant 0 : i32
    %c0_i32_0 = arith.constant 0 : i32
    return %arg0, %c0_i32 : i32, i32
  }
}

</mosaic_0001>

<bundles_post_ra>
// kernel: gae_forward.6
= control target key start
LH: loop header
LB: loop body
LE: loop exit
PB: predicated region body
PF: predicated region fallthrough
CT: control target
= control target key end

     0   :  { %s4716_s0 = inlined_call_operand.vmem [shape: bf16[256,128], index: 0, kind: input, shape index: {}]   ;;  %s4717_s1 = inlined_call_operand.vmem [shape: bf16[256,256], index: 1, kind: input, shape index: {}]   ;;  %s4718_s2 = inlined_call_operand.vmem [shape: f32[256,128], index: 2, kind: input, shape index: {}, may-alias: {2,8}]   ;;  %s4719_s3 = inlined_call_operand.vmem [shape: f32[128,128], index: 3, kind: input, shape index: {}]   ;;  %s4720_s4 = inlined_call_operand.vmem [shape: f32[3,128,128], index: 4, kind: input, shape index: {}]   ;;  %s4721_s5 = inlined_call_operand.vmem [shape: f32[3,128,128], index: 5, kind: input, shape index: {}]   ;;  %s4722_s6 = inlined_call_operand.vmem [shape: f32[3,1,128], index: 6, kind: input, shape index: {}]   ;;  %s4723_s7 = inlined_call_operand.vmem [shape: f32[3,1,128], index: 7, kind: input, shape index: {}]   ;;  %s4724_s8 = inlined_call_operand.vmem [shape: f32[256,128], index: 8, kind: output, shape index: {}, may-alias: {2,8}]  }
   0x1   :  { %4737 = sst [smem:[#allocation16_spill]] %s4717_s1 }
   0x2   :  { %s2823_s27 = smov 0   ;;  %s2825_s28 = smov 0  }
   0x3   :  { %s2827_s29 = smov 0   ;;  %s2829_s30 = smov 0  }
   0x4   :  { %s2831_s9 = smov 0   ;;  %s2833_s10 = smov 0  }
   0x5   :  { %s2835_s11 = smov 0  }
   0x6 LB: > { %s27_s12 = sadd.s32 1, %s2767_s9  ;;  %s30_s13 = sadd.s32 1, %s2771_s10  ;;  %s2775_s11 = sphi %s2835_s11, %s18_s11   ;;  %s2771_s10 = sphi %s2833_s10, %s4844_s10   ;;  %s2767_s9 = sphi %s2831_s9, %s4843_s9   ;;  %s2763_s30 = sphi %s2829_s30, %s4842_s30   ;;  %s2759_s29 = sphi %s2827_s29, %s4841_s29   ;;  %s2755_s28 = sphi %s2825_s28, %s4840_s28   ;;  %s2751_s27 = sphi %s2823_s27, %s4839_s27  }
   0x7   : > { %p28_p0 = scmp.ge.s32.totalorder %s27_s12, 2  ;;  %p72_p1 = scmp.ne.s32.totalorder %s2755_s28, %s2751_s27 }
   0x8   : > { %p73_p2 = scmp.eq.s32.totalorder %s2775_s11, 0  ;;  %s65_s17 = sadd.s32 1, %s2755_s28 }
   0x9   : > { %s4846_s12 = smov (%p28_p0, %s27_s12), 0  ;;  %s4848_s13 = smov (!%p28_p0, %s30_s13), %s2771_s10 }
   0xa   : > { %p74_p3 = por %p73_p2, %p72_p1  ;;  %p32_p4 = scmp.ge.s32.totalorder %s4848_s13, 2 }
   0xb   : > { %s61_s14 = ssub.s32 %s2767_s9, %s4846_s12  ;;  %p2223_p6 = scmp.ge.s32.totalorder %s2775_s11, 4 }
   0xc   : > { %s4850_s13 = smov (%p32_p4, %s4848_s13), 0 }
   0xd   : > { %s60_s15 = ssub.s32 %s2771_s10, %s4850_s13  ;;  %270 = sbr.rel (%p2223_p6) target bundleno = 44 (0x2c), region = 36 }
   0xe   : > { %s62_s16 = sor.u32 %s61_s14, %s60_s15 }
   0xf   : > { %p63_p5 = scmp.eq.s32.totalorder %s62_s16, 0 }
  0x11   : > { %s2874_s18 = scalar_select %p63_p5, %s2755_s28, %s65_s17  }
  0x12   : > { %282 = sbr.rel (!%p74_p3) target bundleno = 44 (0x2c), region = 44  ;;  %s284_s19 = sand.u32 (%p74_p3), 1, %s2755_s28  }
  0x13   : > { %s2404_s20 = sshll.u32 (%p74_p3), %s2771_s10, 5  ;;  %s2224_s21 = sshll.u32 (%p74_p3), %s284_s19, 6 }
  0x14   : > { %s289_s22 = sadd.s32 (%p74_p3), %s2767_s9, %s2404_s20  ;;  %s4738_s1 = sld [smem:[#allocation16_spill]] (%p74_p3) }
  0x15   : > { %s2227_s23 = sshll.u32 (%p74_p3), %s289_s22, 2  ;;  %s286_s14 = scalar_lea.vmem (%p74_p3), [#allocation3], %s2224_s21 }
  0x1a   : > { %s2883_s26 = scalar_lea.vmem %s4738_s1, %s2227_s23 }
  0x1b   : > { %v308_v0 = vld [vmem:[%s2883_s26] sm:$0xf]  ;;  %v310_v1 = vld [vmem:[%s2883_s26 + $0x8] sm:$0xf]  ;;  %v312_v2 = vld [vmem:[%s2883_s26 + $0x10] sm:$0xf] }
  0x1c   : > { %309 = vst [vmem:[%s286_s14] sm:$0xf] %v308_v0  ;;  %v314_v3 = vld [vmem:[%s2883_s26 + $0x18] sm:$0xf]  ;;  %v316_v4 = vld [vmem:[%s2883_s26 + $0x20] sm:$0xf] }
  0x1d   : > { %311 = vst [vmem:[%s286_s14 + $0x4] sm:$0xf] %v310_v1  ;;  %v318_v5 = vld [vmem:[%s2883_s26 + $0x28] sm:$0xf]  ;;  %v320_v6 = vld [vmem:[%s2883_s26 + $0x30] sm:$0xf] }
  0x1e   : > { %313 = vst [vmem:[%s286_s14 + $0x8] sm:$0xf] %v312_v2  ;;  %v322_v7 = vld [vmem:[%s2883_s26 + $0x38] sm:$0xf]  ;;  %v324_v8 = vld [vmem:[%s2883_s26 + $0x40] sm:$0xf] }
  0x1f   : > { %315 = vst [vmem:[%s286_s14 + $0xc] sm:$0xf] %v314_v3  ;;  %v326_v9 = vld [vmem:[%s2883_s26 + $0x48] sm:$0xf]  ;;  %v328_v10 = vld [vmem:[%s2883_s26 + $0x50] sm:$0xf] }
  0x20   : > { %317 = vst [vmem:[%s286_s14 + $0x10] sm:$0xf] %v316_v4  ;;  %v330_v11 = vld [vmem:[%s2883_s26 + $0x58] sm:$0xf]  ;;  %v332_v12 = vld [vmem:[%s2883_s26 + $0x60] sm:$0xf] }
  0x21   : > { %319 = vst [vmem:[%s286_s14 + $0x14] sm:$0xf] %v318_v5  ;;  %v334_v13 = vld [vmem:[%s2883_s26 + $0x68] sm:$0xf]  ;;  %v336_v14 = vld [vmem:[%s2883_s26 + $0x70] sm:$0xf] }
  0x22   : > { %321 = vst [vmem:[%s286_s14 + $0x18] sm:$0xf] %v320_v6  ;;  %v338_v15 = vld [vmem:[%s2883_s26 + $0x78] sm:$0xf] }
  0x23   : > { %323 = vst [vmem:[%s286_s14 + $0x1c] sm:$0xf] %v322_v7 }
  0x24   : > { %325 = vst [vmem:[%s286_s14 + $0x20] sm:$0xf] %v324_v8 }
  0x25   : > { %327 = vst [vmem:[%s286_s14 + $0x24] sm:$0xf] %v326_v9 }
  0x26   : > { %329 = vst [vmem:[%s286_s14 + $0x28] sm:$0xf] %v328_v10 }
  0x27   : > { %331 = vst [vmem:[%s286_s14 + $0x2c] sm:$0xf] %v330_v11 }
  0x28   : > { %333 = vst [vmem:[%s286_s14 + $0x30] sm:$0xf] %v332_v12 }
  0x29   : > { %335 = vst [vmem:[%s286_s14 + $0x34] sm:$0xf] %v334_v13 }
  0x2a   : > { %337 = vst [vmem:[%s286_s14 + $0x38] sm:$0xf] %v336_v14 }
  0x2b   : > { %339 = vst [vmem:[%s286_s14 + $0x3c] sm:$0xf] %v338_v15 }
  0x2c PF: > { %p2228_p7 = scmp.ge.s32.totalorder %s2775_s11, 1  ;;  %p403_p8 = scmp.lt.s32.totalorder %s2775_s11, 5 }
  0x2e   : > { %p404_p9 = pnand %p2228_p7, %p403_p8 }
  0x2f   : > { %s410_s15 = sand.u32 (!%p404_p9), 1, %s2751_s27   ;;  %s2230_s16 = sshll.u32 (!%p404_p9), %s2759_s29, 4 }
  0x30   : > { %407 = sbr.rel (%p404_p9) target bundleno = 793 (0x319), region = 89  ;;  %s2229_s17 = sshll.u32 (!%p404_p9), %s410_s15, 6 }
  0x31   : > { %p454_p10 = scmp.lt.s32.totalorder (!%p404_p9), %s2230_s16, 31  ;;  %s2232_s19 = sshll.u32 (!%p404_p9), %s2763_s30, 4 }
  0x32   : > { %p461_p11 = scmp.lt.s32.totalorder (!%p404_p9), %s2232_s19, 31  ;;  %s2921_s30 = scalar_lea.vmem (!%p404_p9), [#allocation3], %s2229_s17 }
  0x33   : > { %p2236_p12 = scmp.ne.s32.totalorder (!%p404_p9), %s2759_s29, 0 }
  0x35   : > { %s4852_s16 = smov (!%p454_p10, %s2230_s16), 31  ;;  %s4854_s19 = smov (!%p461_p11, %s2232_s19), 31 }
  0x36   : > { %s2231_s20 = sshll.u32 %s4852_s16, 2  ;;  %s2233_s24 = sshll.u32 %s4854_s19, 3 }
  0x37   : > { %s2909_s23 = scalar_lea.vmem %s4716_s0, %s2231_s20  ;;  %s2914_s14 = scalar_lea.vmem %s4718_s2, %s2233_s24 }
  0x38   : > { %s2919_s15 = scalar_lea.vmem %s4724_s8, %s2233_s24  ;;  %475 = sbr.rel (%p2236_p12) target bundleno = 78 (0x4e), region = 97 }
  0x3d   : > { %v2777_v16 = vmov 0.0  }
  0x3e   : > { %476 = vst [vmem:[#allocation2 + $0x30] sm:$0xff] %v2777_v16 }
  0x3f   : > { %477 = vst [vmem:[#allocation2] sm:$0xff] %v2777_v16 }
  0x40   : > { %478 = vst [vmem:[#allocation2 + $0x58] sm:$0xff] %v2777_v16 }
  0x41   : > { %479 = vst [vmem:[#allocation2 + $0x18] sm:$0xff] %v2777_v16 }
  0x42   : > { %480 = vst [vmem:[#allocation2 + $0x50] sm:$0xff] %v2777_v16 }
  0x43   : > { %481 = vst [vmem:[#allocation2 + $0x68] sm:$0xff] %v2777_v16 }
  0x44   : > { %482 = vst [vmem:[#allocation2 + $0x8] sm:$0xff] %v2777_v16 }
  0x45   : > { %483 = vst [vmem:[#allocation2 + $0x48] sm:$0xff] %v2777_v16 }
  0x46   : > { %484 = vst [vmem:[#allocation2 + $0x40] sm:$0xff] %v2777_v16 }
  0x47   : > { %485 = vst [vmem:[#allocation2 + $0x20] sm:$0xff] %v2777_v16 }
  0x48   : > { %486 = vst [vmem:[#allocation2 + $0x10] sm:$0xff] %v2777_v16 }
  0x49   : > { %487 = vst [vmem:[#allocation2 + $0x38] sm:$0xff] %v2777_v16 }
  0x4a   : > { %488 = vst [vmem:[#allocation2 + $0x60] sm:$0xff] %v2777_v16 }
  0x4b   : > { %489 = vst [vmem:[#allocation2 + $0x70] sm:$0xff] %v2777_v16 }
  0x4c   : > { %490 = vst [vmem:[#allocation2 + $0x78] sm:$0xff] %v2777_v16 }
  0x4d   : > { %491 = vst [vmem:[#allocation2 + $0x28] sm:$0xff] %v2777_v16 }
  0x4e PF: > { %v2420_v17 = vld [vmem:[%s2909_s23 + $0x38] sm:$0xff]  ;;  %v2419_v18 = vld [vmem:[%s2909_s23 + $0x30] sm:$0xff]  ;;  %v2418_v19 = vld [vmem:[%s2909_s23 + $0x28] sm:$0xff]  ;;  %p2301_p13 = scmp.ne.s32.totalorder %s2759_s29, 1 }
  0x4f   : > { %636 = vmatpush.bf16.msra.mxu0 %v2420_v17  ;;  %2421 = vmatpush.bf16.msra.mxu1 %v2420_v17  ;;  %v2417_v20 = vld [vmem:[%s2909_s23 + $0x20] sm:$0xff]  ;;  %v2416_v21 = vld [vmem:[%s2909_s23 + $0x18] sm:$0xff]  ;;  %v2415_v22 = vld [vmem:[%s2909_s23 + $0x10] sm:$0xff] }
  0x50   : > { %2422 = vmatpush.bf16.msra.mxu2 %v2420_v17  ;;  %2423 = vmatpush.bf16.msra.mxu3 %v2420_v17  ;;  %v2414_v23 = vld [vmem:[%s2909_s23 + $0x8] sm:$0xff]  ;;  %v2413_v24 = vld [vmem:[%s2909_s23] sm:$0xff]  ;;  %v2407_v26 = vld [vmem:[%s2921_s30 + $0x10] sm:$0xff] }
  0x51   : > { %v2405_v25 = vld [vmem:[%s2921_s30] sm:$0xff]  ;;  %v2411_v28 = vld [vmem:[%s2921_s30 + $0x30] sm:$0xff]  ;;  %v2406_v29 = vld [vmem:[%s2921_s30 + $0x8] sm:$0xff] }
  0x52   : > { %v2409_v27 = vld [vmem:[%s2921_s30 + $0x20] sm:$0xff]  ;;  %v2408_v30 = vld [vmem:[%s2921_s30 + $0x18] sm:$0xff]  ;;  %v2410_v31 = vld [vmem:[%s2921_s30 + $0x28] sm:$0xff] }
  0x53   : > { %637 = vmatpush.bf16.msra.mxu0 %v2419_v18  ;;  %2424 = vmatpush.bf16.msra.mxu1 %v2419_v18  ;;  %v2412_v32 = vld [vmem:[%s2921_s30 + $0x38] sm:$0xff]  ;;  %v492_v33 = vld [vmem:[#allocation2 + $0x30] sm:$0xff]  ;;  %v500_v39 = vld [vmem:[#allocation2 + $0x40] sm:$0xff] }
  0x54   : > { %2425 = vmatpush.bf16.msra.mxu2 %v2419_v18  ;;  %2426 = vmatpush.bf16.msra.mxu3 %v2419_v18  ;;  %v496_v34 = vld [vmem:[#allocation2 + $0x50] sm:$0xff]  ;;  %v504_v40 = vld [vmem:[#allocation2 + $0x60] sm:$0xff]  ;;  %v497_v42 = vld [vmem:[#allocation2 + $0x68] sm:$0xff] }
  0x55   : > { %v493_v41 = vld [vmem:[#allocation2] sm:$0xff]  ;;  %v505_v52 = vld [vmem:[#allocation2 + $0x70] sm:$0xff]  ;;  %v494_v53 = vld [vmem:[#allocation2 + $0x58] sm:$0xff] }
  0x56   : > { %v501_v51 = vld [vmem:[#allocation2 + $0x20] sm:$0xff]  ;;  %v498_v54 = vld [vmem:[#allocation2 + $0x8] sm:$0xff]  ;;  %v502_v63 = vld [vmem:[#allocation2 + $0x10] sm:$0xff] }
  0x57   : > { %638 = vmatpush.bf16.msra.mxu0 %v2418_v19  ;;  %2427 = vmatpush.bf16.msra.mxu1 %v2418_v19  ;;  %v506_v0 = vld [vmem:[#allocation2 + $0x78] sm:$0xff]  ;;  %v499_v2 = vld [vmem:[#allocation2 + $0x48] sm:$0xff] }
  0x58   : > { %2428 = vmatpush.bf16.msra.mxu2 %v2418_v19  ;;  %2429 = vmatpush.bf16.msra.mxu3 %v2418_v19  ;;  %v495_v1 = vld [vmem:[#allocation2 + $0x18] sm:$0xff]  ;;  %v507_v12 = vld [vmem:[#allocation2 + $0x28] sm:$0xff] }
  0x59   : > { %v503_v11 = vld [vmem:[#allocation2 + $0x38] sm:$0xff] }
  0x5b   : > { %639 = vmatpush.bf16.msra.mxu0 %v2417_v20  ;;  %2430 = vmatpush.bf16.msra.mxu1 %v2417_v20 }
  0x5c   : > { %2431 = vmatpush.bf16.msra.mxu2 %v2417_v20  ;;  %2432 = vmatpush.bf16.msra.mxu3 %v2417_v20 }
  0x5f   : > { %640 = vmatpush.bf16.msra.mxu0 %v2416_v21  ;;  %2433 = vmatpush.bf16.msra.mxu1 %v2416_v21 }
  0x60   : > { %2434 = vmatpush.bf16.msra.mxu2 %v2416_v21  ;;  %2435 = vmatpush.bf16.msra.mxu3 %v2416_v21 }
  0x63   : > { %641 = vmatpush.bf16.msra.mxu0 %v2415_v22  ;;  %2436 = vmatpush.bf16.msra.mxu1 %v2415_v22 }
  0x64   : > { %2437 = vmatpush.bf16.msra.mxu2 %v2415_v22  ;;  %2438 = vmatpush.bf16.msra.mxu3 %v2415_v22 }
  0x67   : > { %642 = vmatpush.bf16.msra.mxu0 %v2414_v23  ;;  %2439 = vmatpush.bf16.msra.mxu1 %v2414_v23 }
  0x68   : > { %2440 = vmatpush.bf16.msra.mxu2 %v2414_v23  ;;  %2441 = vmatpush.bf16.msra.mxu3 %v2414_v23 }
  0x6b   : > { %643 = vmatpush.bf16.msra.mxu0 %v2413_v24  ;;  %2442 = vmatpush.bf16.msra.mxu1 %v2413_v24 }
  0x6c   : > { %2443 = vmatpush.bf16.msra.mxu2 %v2413_v24  ;;  %2444 = vmatpush.bf16.msra.mxu3 %v2413_v24 }
  0x6e   : > { %644 = vmatmul.bf16.vlgmr.msra.gmra.mxu0 %v2405_v25  ;;  %654 = vmatmul.bf16.vlgmr.msra.gmra.mxu1 %v2407_v26 }
  0x6f   : > { %664 = vmatmul.bf16.vlgmr.msra.gmra.mxu2 %v2409_v27  ;;  %674 = vmatmul.bf16.vlgmr.msra.gmra.mxu3 %v2411_v28 }
  0x7e   : > { %649 = vmatmul.bf16.gmra.mxu0 %v2406_v29  ;;  %659 = vmatmul.bf16.gmra.mxu1 %v2408_v30 }
  0x7f   : > { %669 = vmatmul.bf16.gmra.mxu2 %v2410_v31  ;;  %679 = vmatmul.bf16.gmra.mxu3 %v2412_v32 }
  0xeb   : > { %v645_v35 = vpop.f32.mrf.mxu0  ;;  %v655_v36 = vpop.f32.mrf.mxu1 }
  0xec   : > { %v685_v37 = vadd.f32 %v645_v35, %v492_v33  ;;  %v689_v38 = vadd.f32 %v655_v36, %v496_v34 }
  0xee   : > { %701 = vst [vmem:[#allocation2 + $0x30] sm:$0xff] %v685_v37 }
  0xef   : > { %705 = vst [vmem:[#allocation2 + $0x50] sm:$0xff] %v689_v38 }
  0xf2   : > { %v665_v43 = vpop.f32.mrf.mxu2  ;;  %v675_v44 = vpop.f32.mrf.mxu3 }
  0xf3   : > { %v693_v45 = vadd.f32 %v665_v43, %v500_v39  ;;  %v697_v46 = vadd.f32 %v675_v44, %v504_v40  ;;  %v647_v47 = vpop.f32.mrf.mxu0  ;;  %v657_v48 = vpop.f32.mrf.mxu1 }
  0xf4   : > { %v686_v49 = vadd.f32 %v647_v47, %v493_v41  ;;  %v690_v50 = vadd.f32 %v657_v48, %v497_v42 }
  0xf5   : > { %709 = vst [vmem:[#allocation2 + $0x40] sm:$0xff] %v693_v45 }
  0xf6   : > { %713 = vst [vmem:[#allocation2 + $0x60] sm:$0xff] %v697_v46 }
  0xf7   : > { %702 = vst [vmem:[#allocation2] sm:$0xff] %v686_v49 }
  0xf8   : > { %706 = vst [vmem:[#allocation2 + $0x68] sm:$0xff] %v690_v50 }
  0xfa   : > { %v667_v55 = vpop.f32.mrf.mxu2  ;;  %v677_v56 = vpop.f32.mrf.mxu3 }
  0xfb   : > { %v694_v57 = vadd.f32 %v667_v55, %v501_v51  ;;  %v698_v58 = vadd.f32 %v677_v56, %v505_v52  ;;  %v650_v59 = vpop.f32.mrf.mxu0  ;;  %v660_v60 = vpop.f32.mrf.mxu1 }
  0xfc   : > { %v687_v61 = vadd.f32 %v650_v59, %v494_v53  ;;  %v691_v62 = vadd.f32 %v660_v60, %v498_v54 }
  0xfd   : > { %710 = vst [vmem:[#allocation2 + $0x20] sm:$0xff] %v694_v57 }
  0xfe   : > { %714 = vst [vmem:[#allocation2 + $0x70] sm:$0xff] %v698_v58 }
  0xff   : > { %703 = vst [vmem:[#allocation2 + $0x58] sm:$0xff] %v687_v61 }
 0x100   : > { %707 = vst [vmem:[#allocation2 + $0x8] sm:$0xff] %v691_v62 }
 0x102   : > { %v670_v3 = vpop.f32.mrf.mxu2  ;;  %v680_v4 = vpop.f32.mrf.mxu3 }
 0x103   : > { %v695_v5 = vadd.f32 %v670_v3, %v502_v63  ;;  %v699_v6 = vadd.f32 %v680_v4, %v506_v0  ;;  %v652_v7 = vpop.f32.mrf.mxu0  ;;  %v662_v8 = vpop.f32.mrf.mxu1 }
 0x104   : > { %v688_v9 = vadd.f32 %v652_v7, %v495_v1  ;;  %v692_v10 = vadd.f32 %v662_v8, %v499_v2 }
 0x105   : > { %711 = vst [vmem:[#allocation2 + $0x10] sm:$0xff] %v695_v5 }
 0x106   : > { %715 = vst [vmem:[#allocation2 + $0x78] sm:$0xff] %v699_v6 }
 0x107   : > { %704 = vst [vmem:[#allocation2 + $0x18] sm:$0xff] %v688_v9 }
 0x108   : > { %708 = vst [vmem:[#allocation2 + $0x48] sm:$0xff] %v692_v10 }
 0x10a   : > { %v672_v13 = vpop.f32.mrf.mxu2  ;;  %v682_v14 = vpop.f32.mrf.mxu3  ;;  %720 = sbr.rel (%p2301_p13) target bundleno = 793 (0x319), region = 101 }
 0x10b   : > { %v696_v15 = vadd.f32 %v672_v13, %v503_v11  ;;  %v700_v16 = vadd.f32 %v682_v14, %v507_v12 }
 0x10d   : > { %712 = vst [vmem:[#allocation2 + $0x38] sm:$0xff] %v696_v15 }
 0x10e   : > { %716 = vst [vmem:[#allocation2 + $0x28] sm:$0xff] %v700_v16 }
 0x10f   : > { %v768_v17 = vld [vmem:[%s4719_s3 + $0x78] sm:$0xff]  ;;  %v767_v18 = vld [vmem:[%s4719_s3 + $0x70] sm:$0xff]  ;;  %v766_v19 = vld [vmem:[%s4719_s3 + $0x68] sm:$0xff] }
 0x110   : > { %769 = vmatpush.msra.mxu0 %v768_v17  ;;  %2445 = vmatpush.msra.mxu3 %v768_v17  ;;  %v765_v20 = vld [vmem:[%s4719_s3 + $0x60] sm:$0xff]  ;;  %v2956_v21 = vld [vmem:[%s4721_s5 + $0x78] sm:$0xff]  ;;  %v2961_v22 = vld [vmem:[%s4721_s5 + $0x70] sm:$0xff] }
 0x111   : > { %v764_v23 = vld [vmem:[%s4719_s3 + $0x58] sm:$0xff]  ;;  %2477 = vmatpush.msra.mxu2 %v2956_v21  ;;  %v2970_v24 = vld [vmem:[%s4721_s5 + $0x68] sm:$0xff]  ;;  %v763_v25 = vld [vmem:[%s4719_s3 + $0x50] sm:$0xff] }
 0x112   : > { %770 = vmatpush.msra.mxu0 %v767_v18  ;;  %2446 = vmatpush.msra.mxu3 %v767_v18  ;;  %v762_v26 = vld [vmem:[%s4719_s3 + $0x48] sm:$0xff]  ;;  %v2982_v27 = vld [vmem:[%s4721_s5 + $0x60] sm:$0xff]  ;;  %v2988_v28 = vld [vmem:[%s4721_s5 + $0x58] sm:$0xff] }
 0x113   : > { %2478 = vmatpush.msra.mxu2 %v2961_v22  ;;  %v761_v29 = vld [vmem:[%s4719_s3 + $0x40] sm:$0xff]  ;;  %v2997_v30 = vld [vmem:[%s4721_s5 + $0x50] sm:$0xff]  ;;  %v760_v31 = vld [vmem:[%s4719_s3 + $0x38] sm:$0xff] }
 0x114   : > { %771 = vmatpush.msra.mxu0 %v766_v19  ;;  %2447 = vmatpush.msra.mxu3 %v766_v19  ;;  %v3006_v32 = vld [vmem:[%s4721_s5 + $0x48] sm:$0xff]  ;;  %v759_v33 = vld [vmem:[%s4719_s3 + $0x30] sm:$0xff]  ;;  %v3015_v34 = vld [vmem:[%s4721_s5 + $0x40] sm:$0xff] }
 0x115   : > { %2479 = vmatpush.msra.mxu2 %v2970_v24  ;;  %v758_v35 = vld [vmem:[%s4719_s3 + $0x28] sm:$0xff]  ;;  %v3024_v36 = vld [vmem:[%s4721_s5 + $0x38] sm:$0xff]  ;;  %v757_v37 = vld [vmem:[%s4719_s3 + $0x20] sm:$0xff] }
 0x116   : > { %772 = vmatpush.msra.mxu0 %v765_v20  ;;  %2448 = vmatpush.msra.mxu3 %v765_v20  ;;  %v3033_v38 = vld [vmem:[%s4721_s5 + $0x30] sm:$0xff]  ;;  %v756_v39 = vld [vmem:[%s4719_s3 + $0x18] sm:$0xff]  ;;  %v3042_v40 = vld [vmem:[%s4721_s5 + $0x28] sm:$0xff] }
 0x117   : > { %2480 = vmatpush.msra.mxu2 %v2982_v27  ;;  %v755_v41 = vld [vmem:[%s4719_s3 + $0x10] sm:$0xff]  ;;  %v3051_v42 = vld [vmem:[%s4721_s5 + $0x20] sm:$0xff]  ;;  %v754_v43 = vld [vmem:[%s4719_s3 + $0x8] sm:$0xff] }
 0x118   : > { %773 = vmatpush.msra.mxu0 %v764_v23  ;;  %2449 = vmatpush.msra.mxu3 %v764_v23  ;;  %v3060_v44 = vld [vmem:[%s4721_s5 + $0x18] sm:$0xff]  ;;  %v753_v45 = vld [vmem:[%s4719_s3] sm:$0xff]  ;;  %v737_v46 = vld [vmem:[#allocation2 + $0x30] sm:$0xff] }
 0x119   : > { %2481 = vmatpush.msra.mxu2 %v2988_v28  ;;  %v741_v47 = vld [vmem:[#allocation2 + $0x50] sm:$0xff]  ;;  %v3075_v49 = vld [vmem:[%s4721_s5 + $0x8] sm:$0xff]  ;;  %v3081_v50 = vld [vmem:[%s4721_s5] sm:$0xff] }
 0x11a   : > { %774 = vmatpush.msra.mxu0 %v763_v25  ;;  %2450 = vmatpush.msra.mxu3 %v763_v25  ;;  %v3070_v48 = vld [vmem:[%s4721_s5 + $0x10] sm:$0xff]  ;;  %v3085_v51 = vld [vmem:[%s2914_s14 + $0x20] sm:$0xff]  ;;  %v742_v53 = vld [vmem:[#allocation2 + $0x68] sm:$0xff] }
 0x11b   : > { %2482 = vmatpush.msra.mxu2 %v2997_v30  ;;  %4739 = vst [vmem:[#allocation4_spill] sm:$0xff] %v3085_v51  ;;  %v738_v52 = vld [vmem:[#allocation2] sm:$0xff]  ;;  %v3090_v54 = vld [vmem:[%s2914_s14 + $0x28] sm:$0xff]  ;;  %v739_v55 = vld [vmem:[#allocation2 + $0x58] sm:$0xff] }
 0x11c   : > { %775 = vmatpush.msra.mxu0 %v762_v26  ;;  %2451 = vmatpush.msra.mxu3 %v762_v26  ;;  %4740 = vst [vmem:[#allocation5_spill] sm:$0xff] %v3090_v54  ;;  %v743_v56 = vld [vmem:[#allocation2 + $0x8] sm:$0xff]  ;;  %v3094_v57 = vld [vmem:[%s2914_s14 + $0x30] sm:$0xff]  ;;  %v740_v58 = vld [vmem:[#allocation2 + $0x18] sm:$0xff] }
 0x11d   : > { %2483 = vmatpush.msra.mxu2 %v3006_v32  ;;  %4741 = vst [vmem:[#allocation6_spill] sm:$0xff] %v3094_v57  ;;  %v744_v59 = vld [vmem:[#allocation2 + $0x48] sm:$0xff]  ;;  %v3098_v60 = vld [vmem:[%s2914_s14 + $0x38] sm:$0xff]  ;;  %v745_v61 = vld [vmem:[#allocation2 + $0x40] sm:$0xff] }
 0x11e   : > { %776 = vmatpush.msra.mxu0 %v761_v29  ;;  %2452 = vmatpush.msra.mxu3 %v761_v29  ;;  %4742 = vst [vmem:[#allocation7_spill] sm:$0xff] %v3098_v60  ;;  %v3102_v62 = vld [vmem:[%s2914_s14 + $0x40] sm:$0xff]  ;;  %v3106_v0 = vld [vmem:[%s2914_s14 + $0x48] sm:$0xff]  ;;  %v747_v1 = vld [vmem:[#allocation2 + $0x10] sm:$0xff] }
 0x11f   : > { %2484 = vmatpush.msra.mxu2 %v3015_v34  ;;  %4743 = vst [vmem:[#allocation8_spill] sm:$0xff] %v3102_v62  ;;  %v746_v63 = vld [vmem:[#allocation2 + $0x20] sm:$0xff]  ;;  %v3110_v2 = vld [vmem:[%s2914_s14 + $0x50] sm:$0xff]  ;;  %v748_v3 = vld [vmem:[#allocation2 + $0x38] sm:$0xff] }
 0x120   : > { %777 = vmatpush.msra.mxu0 %v760_v31  ;;  %2453 = vmatpush.msra.mxu3 %v760_v31  ;;  %4744 = vst [vmem:[#allocation9_spill] sm:$0xff] %v3106_v0  ;;  %v2368_v4 = vld [vmem:[%s4721_s5 + $0x178] sm:$0xff]  ;;  %v2367_v7 = vld [vmem:[%s4721_s5 + $0x170] sm:$0xff]  ;;  %v2366_v10 = vld [vmem:[%s4721_s5 + $0x168] sm:$0xff] }
 0x121   : > { %2485 = vmatpush.msra.mxu2 %v3024_v36  ;;  %4745 = vst [vmem:[#allocation10_spill] sm:$0xff] %v3110_v2  ;;  %v849_v5 = vld [vmem:[%s4720_s4 + $0x78] sm:$0xff]  ;;  %v848_v8 = vld [vmem:[%s4720_s4 + $0x70] sm:$0xff]  ;;  %v847_v11 = vld [vmem:[%s4720_s4 + $0x68] sm:$0xff] }
 0x122   : > { %778 = vmatpush.msra.mxu0 %v759_v33  ;;  %2454 = vmatpush.msra.mxu3 %v759_v33  ;;  %v2317_v6 = vld [vmem:[%s4720_s4 + $0xf8] sm:$0xff]  ;;  %v2316_v9 = vld [vmem:[%s4720_s4 + $0xf0] sm:$0xff]  ;;  %v2315_v13 = vld [vmem:[%s4720_s4 + $0xe8] sm:$0xff] }
 0x123   : > { %2486 = vmatpush.msra.mxu2 %v3033_v38  ;;  %2461 = vmatpush.msra.mxu1 %v849_v5  ;;  %v3138_v12 = vld [vmem:[%s2914_s14 + $0x58] sm:$0xff]  ;;  %v2365_v14 = vld [vmem:[%s4721_s5 + $0x160] sm:$0xff]  ;;  %v2363_v23 = vld [vmem:[%s4721_s5 + $0x150] sm:$0xff] }
 0x124   : > { %779 = vmatpush.msra.mxu0 %v758_v35  ;;  %2455 = vmatpush.msra.mxu3 %v758_v35  ;;  %4746 = vst [vmem:[#allocation11_spill] sm:$0xff] %v3138_v12  ;;  %v846_v15 = vld [vmem:[%s4720_s4 + $0x60] sm:$0xff]  ;;  %v2364_v18 = vld [vmem:[%s4721_s5 + $0x158] sm:$0xff]  ;;  %v844_v25 = vld [vmem:[%s4720_s4 + $0x50] sm:$0xff] }
 0x125   : > { %2487 = vmatpush.msra.mxu2 %v3042_v40  ;;  %2462 = vmatpush.msra.mxu1 %v848_v8  ;;  %v749_v16 = vld [vmem:[#allocation2 + $0x60] sm:$0xff]  ;;  %v845_v19 = vld [vmem:[%s4720_s4 + $0x58] sm:$0xff]  ;;  %v2312_v26 = vld [vmem:[%s4720_s4 + $0xd0] sm:$0xff] }
 0x126   : > { %780 = vmatpush.msra.mxu0 %v757_v37  ;;  %2456 = vmatpush.msra.mxu3 %v757_v37  ;;  %v2314_v17 = vld [vmem:[%s4720_s4 + $0xe0] sm:$0xff]  ;;  %v2313_v20 = vld [vmem:[%s4720_s4 + $0xd8] sm:$0xff]  ;;  %v2362_v29 = vld [vmem:[%s4721_s5 + $0x148] sm:$0xff] }
 0x127   : > { %2488 = vmatpush.msra.mxu2 %v3051_v42  ;;  %2463 = vmatpush.msra.mxu1 %v847_v11  ;;  %v3175_v31 = vld [vmem:[%s2914_s14 + $0x60] sm:$0xff]  ;;  %v843_v33 = vld [vmem:[%s4720_s4 + $0x48] sm:$0xff] }
 0x128   : > { %781 = vmatpush.msra.mxu0 %v756_v39  ;;  %2457 = vmatpush.msra.mxu3 %v756_v39  ;;  %4747 = vst [vmem:[#allocation12_spill] sm:$0xff] %v3175_v31  ;;  %v2311_v35 = vld [vmem:[%s4720_s4 + $0xc8] sm:$0xff]  ;;  %v2361_v37 = vld [vmem:[%s4721_s5 + $0x140] sm:$0xff]  ;;  %v750_v39 = vld [vmem:[#allocation2 + $0x70] sm:$0xff] }
 0x129   : > { %2489 = vmatpush.msra.mxu2 %v3060_v44  ;;  %2464 = vmatpush.msra.mxu1 %v846_v15 }
 0x12a   : > { %782 = vmatpush.msra.mxu0 %v755_v41  ;;  %2458 = vmatpush.msra.mxu3 %v755_v41  ;;  %v842_v41 = vld [vmem:[%s4720_s4 + $0x40] sm:$0xff] }
 0x12b   : > { %2490 = vmatpush.msra.mxu2 %v3070_v48  ;;  %2465 = vmatpush.msra.mxu1 %v845_v19 }
 0x12c   : > { %783 = vmatpush.msra.mxu0 %v754_v43  ;;  %2459 = vmatpush.msra.mxu3 %v754_v43  ;;  %v2310_v43 = vld [vmem:[%s4720_s4 + $0xc0] sm:$0xff] }
 0x12d   : > { %2491 = vmatpush.msra.mxu2 %v3075_v49  ;;  %2466 = vmatpush.msra.mxu1 %v844_v25 }
 0x12e   : > { %784 = vmatpush.msra.mxu0 %v753_v45  ;;  %2460 = vmatpush.msra.mxu3 %v753_v45  ;;  %v2360_v45 = vld [vmem:[%s4721_s5 + $0x138] sm:$0xff] }
 0x12f   : > { %785 = vmatmul.f32.vlgmr.msra.gmra.mxu0 %v737_v46  ;;  %797 = vmatmul.f32.vlgmr.msra.gmra.mxu3 %v741_v47  ;;  %v841_v46 = vld [vmem:[%s4720_s4 + $0x38] sm:$0xff] }
 0x130   : > { %2492 = vmatpush.msra.mxu2 %v3081_v50  ;;  %854 = vmatpush.msrb.mxu0 %v849_v5  ;;  %v2309_v47 = vld [vmem:[%s4720_s4 + $0xb8] sm:$0xff] }
 0x131   : > { %967 = vmatmul.f32.vlgmr.msra.gmra.mxu2 %v3085_v51  ;;  %1026 = vmatpush.msrb.mxu3 %v2317_v6  ;;  %v2356_v5 = vld [vmem:[%s4721_s5 + $0x118] sm:$0xff] }
 0x132   : > { %1287 = vmatpush.msrb.mxu2 %v2368_v4  ;;  %855 = vmatpush.msrb.mxu0 %v848_v8  ;;  %v2306_v4 = vld [vmem:[%s4720_s4 + $0xa0] sm:$0xff]  ;;  %v837_v6 = vld [vmem:[%s4720_s4 + $0x18] sm:$0xff]  ;;  %v2355_v8 = vld [vmem:[%s4721_s5 + $0x110] sm:$0xff] }
 0x133   : > { %1027 = vmatpush.msrb.mxu3 %v2316_v9  ;;  %2467 = vmatpush.msra.mxu1 %v843_v33  ;;  %v836_v9 = vld [vmem:[%s4720_s4 + $0x10] sm:$0xff] }
 0x134   : > { %1288 = vmatpush.msrb.mxu2 %v2367_v7  ;;  %856 = vmatpush.msrb.mxu0 %v847_v11  ;;  %v2305_v7 = vld [vmem:[%s4720_s4 + $0x98] sm:$0xff]  ;;  %v2304_v11 = vld [vmem:[%s4720_s4 + $0x90] sm:$0xff] }
 0x135   : > { %1028 = vmatpush.msrb.mxu3 %v2315_v13  ;;  %2468 = vmatpush.msra.mxu1 %v842_v41  ;;  %v2354_v13 = vld [vmem:[%s4721_s5 + $0x108] sm:$0xff] }
 0x136   : > { %1289 = vmatpush.msrb.mxu2 %v2366_v10  ;;  %857 = vmatpush.msrb.mxu0 %v846_v15  ;;  %v3249_v10 = vld [vmem:[%s2914_s14 + $0x70] sm:$0xff]  ;;  %v835_v15 = vld [vmem:[%s4720_s4 + $0x8] sm:$0xff] }
 0x137   : > { %788 = vmatmul.f32.gmra.mxu0 %v738_v52  ;;  %800 = vmatmul.f32.gmra.mxu3 %v742_v53  ;;  %v2359_v52 = vld [vmem:[%s4721_s5 + $0x130] sm:$0xff]  ;;  %4749 = vst [vmem:[#allocation14_spill] sm:$0xff] %v3249_v10 }
 0x138   : > { %1290 = vmatpush.msrb.mxu2 %v2365_v14  ;;  %1029 = vmatpush.msrb.mxu3 %v2314_v17  ;;  %v840_v53 = vld [vmem:[%s4720_s4 + $0x30] sm:$0xff]  ;;  %v752_v14 = vld [vmem:[#allocation2 + $0x28] sm:$0xff]  ;;  %v2353_v17 = vld [vmem:[%s4721_s5 + $0x100] sm:$0xff] }
 0x139   : > { %970 = vmatmul.f32.gmra.mxu2 %v3090_v54  ;;  %858 = vmatpush.msrb.mxu0 %v845_v19  ;;  %v834_v19 = vld [vmem:[%s4720_s4] sm:$0xff] }
 0x13a   : > { %1291 = vmatpush.msrb.mxu2 %v2364_v18  ;;  %1030 = vmatpush.msrb.mxu3 %v2313_v20  ;;  %v3268_v18 = vld [vmem:[%s2914_s14 + $0x78] sm:$0xff]  ;;  %v2302_v20 = vld [vmem:[%s4720_s4 + $0x80] sm:$0xff] }
 0x13b   : > { %859 = vmatpush.msrb.mxu0 %v844_v25  ;;  %2469 = vmatpush.msra.mxu1 %v841_v46  ;;  %4750 = vst [vmem:[#allocation15_spill] sm:$0xff] %v3268_v18  ;;  %v2351_v25 = vld [vmem:[%s4720_s4 + $0x178] sm:$0xff] }
 0x13c   : > { %1292 = vmatpush.msrb.mxu2 %v2363_v23  ;;  %1031 = vmatpush.msrb.mxu3 %v2312_v26  ;;  %v3281_v23 = vld [vmem:[%s2914_s14] sm:$0xff]  ;;  %v2345_v26 = vld [vmem:[%s4720_s4 + $0x148] sm:$0xff] }
 0x13d   : > { %860 = vmatpush.msrb.mxu0 %v843_v33  ;;  %2470 = vmatpush.msra.mxu1 %v840_v53 }
 0x13e   : > { %1293 = vmatpush.msrb.mxu2 %v2362_v29  ;;  %1032 = vmatpush.msrb.mxu3 %v2311_v35  ;;  %v2329_v29 = vld [vmem:[%s4721_s5 + $0xd0] sm:$0xff]  ;;  %v2328_v35 = vld [vmem:[%s4721_s5 + $0xc8] sm:$0xff] }
 0x13f   : > { %791 = vmatmul.f32.gmra.mxu0 %v739_v55  ;;  %803 = vmatmul.f32.gmra.mxu3 %v743_v56  ;;  %v2308_v55 = vld [vmem:[%s4720_s4 + $0xb0] sm:$0xff]  ;;  %v2358_v56 = vld [vmem:[%s4721_s5 + $0x128] sm:$0xff] }
 0x140   : > { %1294 = vmatpush.msrb.mxu2 %v2361_v37  ;;  %861 = vmatpush.msrb.mxu0 %v842_v41 }
 0x141   : > { %973 = vmatmul.f32.gmra.mxu2 %v3094_v57  ;;  %1033 = vmatpush.msrb.mxu3 %v2310_v43  ;;  %v2344_v43 = vld [vmem:[%s4720_s4 + $0x140] sm:$0xff] }
 0x142   : > { %1295 = vmatpush.msrb.mxu2 %v2360_v45  ;;  %862 = vmatpush.msrb.mxu0 %v841_v46  ;;  %v2326_v45 = vld [vmem:[%s4721_s5 + $0xb8] sm:$0xff]  ;;  %v2325_v46 = vld [vmem:[%s4721_s5 + $0xb0] sm:$0xff] }
 0x143   : > { %1034 = vmatpush.msrb.mxu3 %v2309_v47 }
 0x144   : > { %1296 = vmatpush.msrb.mxu2 %v2359_v52  ;;  %863 = vmatpush.msrb.mxu0 %v840_v53  ;;  %v2324_v52 = vld [vmem:[%s4721_s5 + $0xa8] sm:$0xff] }
 0x145   : > { %1035 = vmatpush.msrb.mxu3 %v2308_v55  ;;  %v2343_v55 = vld [vmem:[%s4720_s4 + $0x138] sm:$0xff] }
 0x146   : > { %1297 = vmatpush.msrb.mxu2 %v2358_v56  ;;  %v2323_v56 = vld [vmem:[%s4721_s5 + $0xa0] sm:$0xff] }
 0x147   : > { %794 = vmatmul.f32.gmra.mxu0 %v740_v58  ;;  %806 = vmatmul.f32.gmra.mxu3 %v744_v59  ;;  %v3215_v58 = vld [vmem:[%s2914_s14 + $0x68] sm:$0xff] }
 0x148   : > { %4748 = vst [vmem:[#allocation13_spill] sm:$0xff] %v3215_v58  ;;  %v839_v59 = vld [vmem:[%s4720_s4 + $0x28] sm:$0xff] }
 0x149   : > { %976 = vmatmul.f32.gmra.mxu2 %v3098_v60  ;;  %864 = vmatpush.msrb.mxu0 %v839_v59 }
 0x14a   : > { %2471 = vmatpush.msra.mxu1 %v839_v59 }
 0x14f   : > { %809 = vmatmul.f32.gmra.mxu3 %v745_v61  ;;  %v2307_v61 = vld [vmem:[%s4720_s4 + $0xa8] sm:$0xff] }
 0x150   : > { %1036 = vmatpush.msrb.mxu3 %v2307_v61  ;;  %v2322_v61 = vld [vmem:[%s4721_s5 + $0x98] sm:$0xff] }
 0x151   : > { %979 = vmatmul.f32.gmra.mxu2 %v3102_v62 }
 0x152   : > { %1037 = vmatpush.msrb.mxu3 %v2306_v4  ;;  %v2320_v4 = vld [vmem:[%s4721_s5 + $0x88] sm:$0xff] }
 0x154   : > { %1038 = vmatpush.msrb.mxu3 %v2305_v7  ;;  %v2341_v7 = vld [vmem:[%s4720_s4 + $0x128] sm:$0xff] }
 0x156   : > { %1039 = vmatpush.msrb.mxu3 %v2304_v11  ;;  %v2340_v11 = vld [vmem:[%s4720_s4 + $0x120] sm:$0xff] }
 0x157   : > { %812 = vmatmul.f32.gmra.mxu3 %v746_v63  ;;  %v751_v63 = vld [vmem:[#allocation2 + $0x78] sm:$0xff] }
 0x159   : > { %982 = vmatmul.f32.gmra.mxu2 %v3106_v0 }
 0x15f   : > { %815 = vmatmul.f32.gmra.mxu3 %v747_v1  ;;  %v2357_v1 = vld [vmem:[%s4721_s5 + $0x120] sm:$0xff] }
 0x160   : > { %1298 = vmatpush.msrb.mxu2 %v2357_v1  ;;  %v2321_v1 = vld [vmem:[%s4721_s5 + $0x90] sm:$0xff] }
 0x161   : > { %985 = vmatmul.f32.gmra.mxu2 %v3110_v2 }
 0x162   : > { %1299 = vmatpush.msrb.mxu2 %v2356_v5 }
 0x164   : > { %1300 = vmatpush.msrb.mxu2 %v2355_v8 }
 0x166   : > { %1301 = vmatpush.msrb.mxu2 %v2354_v13 }
 0x167   : > { %818 = vmatmul.f32.gmra.mxu3 %v748_v3  ;;  %v838_v3 = vld [vmem:[%s4720_s4 + $0x20] sm:$0xff] }
 0x168   : > { %865 = vmatpush.msrb.mxu0 %v838_v3  ;;  %2472 = vmatpush.msra.mxu1 %v838_v3 }
 0x169   : > { %988 = vmatmul.f32.gmra.mxu2 %v3138_v12 }
 0x16a   : > { %866 = vmatpush.msrb.mxu0 %v837_v6  ;;  %1302 = vmatpush.msrb.mxu2 %v2353_v17 }
 0x16b   : > { %2473 = vmatpush.msra.mxu1 %v837_v6  ;;  %v2319_v6 = vld [vmem:[%s4721_s5 + $0x80] sm:$0xff] }
 0x16c   : > { %867 = vmatpush.msrb.mxu0 %v836_v9 }
 0x16d   : > { %2474 = vmatpush.msra.mxu1 %v836_v9 }
 0x16e   : > { %868 = vmatpush.msrb.mxu0 %v835_v15 }
 0x16f   : > { %821 = vmatmul.f32.gmra.mxu3 %v749_v16  ;;  %v2303_v16 = vld [vmem:[%s4720_s4 + $0x88] sm:$0xff]  ;;  %2475 = vmatpush.msra.mxu1 %v835_v15  ;;  %v2339_v15 = vld [vmem:[%s4720_s4 + $0x118] sm:$0xff] }
 0x170   : > { %1040 = vmatpush.msrb.mxu3 %v2303_v16  ;;  %869 = vmatpush.msrb.mxu0 %v834_v19  ;;  %v2338_v16 = vld [vmem:[%s4720_s4 + $0x110] sm:$0xff] }
 0x171   : > { %991 = vmatmul.f32.gmra.mxu2 %v3175_v31  ;;  %2476 = vmatpush.msra.mxu1 %v834_v19 }
 0x172   : > { %1041 = vmatpush.msrb.mxu3 %v2302_v20  ;;  %939 = vmatpush.msra.mxu0 %v2956_v21  ;;  %v2350_v21 = vld [vmem:[%s4720_s4 + $0x170] sm:$0xff]  ;;  %v2337_v20 = vld [vmem:[%s4720_s4 + $0x108] sm:$0xff] }
 0x173   : > { %1200 = vmatpush.msrb.mxu1 %v2351_v25 }
 0x174   : > { %940 = vmatpush.msra.mxu0 %v2961_v22  ;;  %v3295_v22 = vld [vmem:[%s2914_s14 + $0x8] sm:$0xff] }
 0x175   : > { %1201 = vmatpush.msrb.mxu1 %v2350_v21 }
 0x176   : > { %941 = vmatpush.msra.mxu0 %v2970_v24  ;;  %v2349_v24 = vld [vmem:[%s4720_s4 + $0x168] sm:$0xff] }
 0x177   : > { %824 = vmatmul.f32.gmra.mxu3 %v750_v39  ;;  %1202 = vmatpush.msrb.mxu1 %v2349_v24  ;;  %v2327_v39 = vld [vmem:[%s4721_s5 + $0xc0] sm:$0xff] }
 0x178   : > { %942 = vmatpush.msra.mxu0 %v2982_v27  ;;  %v3306_v27 = vld [vmem:[%s2914_s14 + $0x10] sm:$0xff]  ;;  %v2336_v24 = vld [vmem:[%s4720_s4 + $0x100] sm:$0xff] }
 0x179   : > { %994 = vmatmul.f32.gmra.mxu2 %v3215_v58 }
 0x17a   : > { %943 = vmatpush.msra.mxu0 %v2988_v28  ;;  %v2348_v28 = vld [vmem:[%s4720_s4 + $0x160] sm:$0xff] }
 0x17b   : > { %1203 = vmatpush.msrb.mxu1 %v2348_v28 }
 0x17c   : > { %944 = vmatpush.msra.mxu0 %v2997_v30  ;;  %v3317_v30 = vld [vmem:[%s2914_s14 + $0x18] sm:$0xff] }
 0x17e   : > { %945 = vmatpush.msra.mxu0 %v3006_v32  ;;  %v2347_v32 = vld [vmem:[%s4720_s4 + $0x158] sm:$0xff] }
 0x17f   : > { %827 = vmatmul.f32.gmra.mxu3 %v751_v63  ;;  %1204 = vmatpush.msrb.mxu1 %v2347_v32  ;;  %v2342_v63 = vld [vmem:[%s4720_s4 + $0x130] sm:$0xff] }
 0x180   : > { %946 = vmatpush.msra.mxu0 %v3015_v34 }
 0x181   : > { %997 = vmatmul.f32.gmra.mxu2 %v3249_v10 }
 0x182   : > { %947 = vmatpush.msra.mxu0 %v3024_v36  ;;  %v2334_v36 = vld [vmem:[%s4721_s5 + $0xf8] sm:$0xff] }
 0x184   : > { %948 = vmatpush.msra.mxu0 %v3033_v38  ;;  %v2333_v38 = vld [vmem:[%s4721_s5 + $0xf0] sm:$0xff] }
 0x186   : > { %949 = vmatpush.msra.mxu0 %v3042_v40  ;;  %v2346_v40 = vld [vmem:[%s4720_s4 + $0x150] sm:$0xff] }
 0x187   : > { %830 = vmatmul.f32.gmra.mxu3 %v752_v14  ;;  %1205 = vmatpush.msrb.mxu1 %v2346_v40 }
 0x188   : > { %950 = vmatpush.msra.mxu0 %v3051_v42  ;;  %v2332_v42 = vld [vmem:[%s4721_s5 + $0xe8] sm:$0xff] }
 0x189   : > { %1000 = vmatmul.f32.gmra.mxu2 %v3268_v18  ;;  %1206 = vmatpush.msrb.mxu1 %v2345_v26 }
 0x18a   : > { %951 = vmatpush.msra.mxu0 %v3060_v44 }
 0x18b   : > { %1207 = vmatpush.msrb.mxu1 %v2344_v43 }
 0x18c   : > { %952 = vmatpush.msra.mxu0 %v3070_v48  ;;  %v2331_v48 = vld [vmem:[%s4721_s5 + $0xe0] sm:$0xff] }
 0x18d   : > { %1208 = vmatpush.msrb.mxu1 %v2343_v55 }
 0x18e   : > { %953 = vmatpush.msra.mxu0 %v3075_v49 }
 0x18f   : > { %1209 = vmatpush.msrb.mxu1 %v2342_v63 }
 0x190   : > { %954 = vmatpush.msra.mxu0 %v3081_v50  ;;  %v2330_v50 = vld [vmem:[%s4721_s5 + $0xd8] sm:$0xff] }
 0x191   : > { %1303 = vmatmul.f32.vlgmr.msrb.gmra.mxu2 %v3281_v23  ;;  %1210 = vmatpush.msrb.mxu1 %v2341_v7 }
 0x193   : > { %1211 = vmatpush.msrb.mxu1 %v2340_v11 }
 0x195   : > { %1212 = vmatpush.msrb.mxu1 %v2339_v15 }
 0x197   : > { %1213 = vmatpush.msrb.mxu1 %v2338_v16 }
 0x199   : > { %1306 = vmatmul.f32.gmra.mxu2 %v3295_v22  ;;  %1214 = vmatpush.msrb.mxu1 %v2337_v20 }
 0x19b   : > { %1215 = vmatpush.msrb.mxu1 %v2336_v24 }
 0x1a1   : > { %1309 = vmatmul.f32.gmra.mxu2 %v3306_v27 }
 0x1a9   : > { %1312 = vmatmul.f32.gmra.mxu2 %v3317_v30 }
 0x1ac   : > { %v3323_v34 = vpop.f32.mrf.mxu0 }
 0x1ad   : > { %870 = vmatmul.f32.vlgmr.msrb.gmra.mxu0 %v3323_v34  ;;  %1042 = vmatmul.f32.vlgmr.msrb.gmra.mxu3 %v3323_v34 }
 0x1ae   : > { %1113 = vmatpush.msrb.mxu0 %v2334_v36 }
 0x1b0   : > { %1114 = vmatpush.msrb.mxu0 %v2333_v38 }
 0x1b1   : > { %1315 = vmatmul.f32.gmra.mxu2 %v3085_v51 }
 0x1b2   : > { %v3340_v44 = vpop.f32.mrf.mxu3  ;;  %1115 = vmatpush.msrb.mxu0 %v2332_v42 }
 0x1b3   : > { %882 = vmatmul.f32.vlgmr.msra.gmra.mxu1 %v3340_v44 }
 0x1b4   : > { %v3346_v49 = vpop.f32.mrf.mxu0  ;;  %1116 = vmatpush.msrb.mxu0 %v2331_v48  ;;  %v3360_v33 = vpop.f32.mrf.mxu2 }
 0x1b5   : > { %873 = vmatmul.f32.gmra.mxu0 %v3346_v49  ;;  %1045 = vmatmul.f32.gmra.mxu3 %v3346_v49 }
 0x1b6   : > { %1117 = vmatpush.msrb.mxu0 %v2330_v50 }
 0x1b8   : > { %1118 = vmatpush.msrb.mxu0 %v2329_v29 }
 0x1b9   : > { %1318 = vmatmul.f32.gmra.mxu2 %v3090_v54 }
 0x1ba   : > { %v3365_v37 = vpop.f32.mrf.mxu3  ;;  %1119 = vmatpush.msrb.mxu0 %v2328_v35 }
 0x1bb   : > { %885 = vmatmul.f32.gmra.mxu1 %v3365_v37 }
 0x1bc   : > { %v3371_v41 = vpop.f32.mrf.mxu0  ;;  %1120 = vmatpush.msrb.mxu0 %v2327_v39  ;;  %v3385_v47 = vpop.f32.mrf.mxu2  ;;  %v3534_v39 = vld [vmem:[%s4722_s6] ss:$0 sm:$0xff] }
 0x1bd   : > { %876 = vmatmul.f32.gmra.mxu0 %v3371_v41  ;;  %1048 = vmatmul.f32.gmra.mxu3 %v3371_v41 }
 0x1be   : > { %1121 = vmatpush.msrb.mxu0 %v2326_v45 }
 0x1c0   : > { %1122 = vmatpush.msrb.mxu0 %v2325_v46 }
 0x1c1   : > { %1321 = vmatmul.f32.gmra.mxu2 %v3094_v57 }
 0x1c2   : > { %v3390_v53 = vpop.f32.mrf.mxu3  ;;  %1123 = vmatpush.msrb.mxu0 %v2324_v52 }
 0x1c3   : > { %888 = vmatmul.f32.gmra.mxu1 %v3390_v53 }
 0x1c4   : > { %v3399_v59 = vpop.f32.mrf.mxu0  ;;  %1124 = vmatpush.msrb.mxu0 %v2323_v56  ;;  %v3413_v3 = vpop.f32.mrf.mxu2 }
 0x1c5   : > { %879 = vmatmul.f32.gmra.mxu0 %v3399_v59  ;;  %1051 = vmatmul.f32.gmra.mxu3 %v3399_v59 }
 0x1c6   : > { %1125 = vmatpush.msrb.mxu0 %v2322_v61 }
 0x1c8   : > { %1126 = vmatpush.msrb.mxu0 %v2321_v1 }
 0x1c9   : > { %1324 = vmatmul.f32.gmra.mxu2 %v3098_v60 }
 0x1ca   : > { %v3418_v5 = vpop.f32.mrf.mxu3  ;;  %1127 = vmatpush.msrb.mxu0 %v2320_v4 }
 0x1cb   : > { %891 = vmatmul.f32.gmra.mxu1 %v3418_v5 }
 0x1cc   : > { %1128 = vmatpush.msrb.mxu0 %v2319_v6  ;;  %v3430_v8 = vpop.f32.mrf.mxu2 }
 0x1cd   : > { %955 = vmatmul.f32.vlgmr.msra.gmra.mxu0 %v3281_v23  ;;  %1054 = vmatmul.f32.gmra.mxu3 %v3340_v44 }
 0x1d1   : > { %1327 = vmatmul.f32.gmra.mxu2 %v3102_v62 }
 0x1d2   : > { %v3432_v9 = vpop.f32.mrf.mxu3 }
 0x1d3   : > { %894 = vmatmul.f32.gmra.mxu1 %v3432_v9 }
 0x1d4   : > { %v3441_v13 = vpop.f32.mrf.mxu2 }
 0x1d5   : > { %958 = vmatmul.f32.gmra.mxu0 %v3295_v22  ;;  %1057 = vmatmul.f32.gmra.mxu3 %v3365_v37 }
 0x1d9   : > { %1330 = vmatmul.f32.gmra.mxu2 %v3106_v0 }
 0x1da   : > { %v3443_v14 = vpop.f32.mrf.mxu3 }
 0x1db   : > { %897 = vmatmul.f32.gmra.mxu1 %v3443_v14 }
 0x1dc   : > { %v3455_v17 = vpop.f32.mrf.mxu2 }
 0x1dd   : > { %961 = vmatmul.f32.gmra.mxu0 %v3306_v27  ;;  %1060 = vmatmul.f32.gmra.mxu3 %v3390_v53 }
 0x1e1   : > { %1333 = vmatmul.f32.gmra.mxu2 %v3110_v2 }
 0x1e2   : > { %v3457_v19 = vpop.f32.mrf.mxu3 }
 0x1e3   : > { %900 = vmatmul.f32.gmra.mxu1 %v3457_v19 }
 0x1e4   : > { %v3466_v25 = vpop.f32.mrf.mxu2 }
 0x1e5   : > { %964 = vmatmul.f32.gmra.mxu0 %v3317_v30  ;;  %1063 = vmatmul.f32.gmra.mxu3 %v3418_v5 }
 0x1e9   : > { %1336 = vmatmul.f32.gmra.mxu2 %v3138_v12 }
 0x1ea   : > { %v3468_v21 = vpop.f32.mrf.mxu3 }
 0x1eb   : > { %903 = vmatmul.f32.gmra.mxu1 %v3468_v21 }
 0x1ec   : > { %v3477_v28 = vpop.f32.mrf.mxu2 }
 0x1ed   : > { %1066 = vmatmul.f32.gmra.mxu3 %v3432_v9  ;;  %1129 = vmatmul.f32.vlgmr.msrb.gmra.mxu0 %v3281_v23 }
 0x1f1   : > { %1339 = vmatmul.f32.gmra.mxu2 %v3175_v31 }
 0x1f2   : > { %v3479_v32 = vpop.f32.mrf.mxu3 }
 0x1f3   : > { %906 = vmatmul.f32.gmra.mxu1 %v3479_v32 }
 0x1f4   : > { %v3488_v36 = vpop.f32.mrf.mxu2 }
 0x1f5   : > { %1069 = vmatmul.f32.gmra.mxu3 %v3443_v14  ;;  %1132 = vmatmul.f32.gmra.mxu0 %v3295_v22 }
 0x1f9   : > { %1342 = vmatmul.f32.gmra.mxu2 %v3215_v58 }
 0x1fa   : > { %v3485_v23 = vpop.f32.mrf.mxu3 }
 0x1fb   : > { %909 = vmatmul.f32.gmra.mxu1 %v3485_v23 }
 0x1fc   : > { %v3498_v40 = vpop.f32.mrf.mxu2 }
 0x1fd   : > { %1072 = vmatmul.f32.gmra.mxu3 %v3457_v19  ;;  %1135 = vmatmul.f32.gmra.mxu0 %v3306_v27 }
 0x201   : > { %1345 = vmatmul.f32.gmra.mxu2 %v3249_v10 }
 0x202   : > { %v3493_v38 = vpop.f32.mrf.mxu3 }
 0x203   : > { %912 = vmatmul.f32.gmra.mxu1 %v3493_v38 }
 0x204   : > { %v3507_v48 = vpop.f32.mrf.mxu2 }
 0x205   : > { %1075 = vmatmul.f32.gmra.mxu3 %v3468_v21  ;;  %1138 = vmatmul.f32.gmra.mxu0 %v3317_v30 }
 0x209   : > { %1348 = vmatmul.f32.gmra.mxu2 %v3268_v18 }
 0x20a   : > { %v3501_v42 = vpop.f32.mrf.mxu3 }
 0x20b   : > { %915 = vmatmul.f32.gmra.mxu1 %v3501_v42 }
 0x20c   : > { %v3512_v50 = vpop.f32.mrf.mxu2 }
 0x20d   : > { %1078 = vmatmul.f32.gmra.mxu3 %v3479_v32  ;;  %1141 = vmatmul.f32.gmra.mxu0 %v3085_v51 }
 0x213   : > { %1216 = vmatmul.f32.vlgmr.msrb.gmra.mxu1 %v3323_v34 }
 0x214   : > { %v3518_v26 = vpop.f32.mrf.mxu2 }
 0x215   : > { %1081 = vmatmul.f32.gmra.mxu3 %v3485_v23  ;;  %1144 = vmatmul.f32.gmra.mxu0 %v3090_v54 }
 0x21b   : > { %1219 = vmatmul.f32.gmra.mxu1 %v3346_v49 }
 0x21c   : > { %v3526_v29 = vpop.f32.mrf.mxu2 }
 0x21d   : > { %1084 = vmatmul.f32.gmra.mxu3 %v3493_v38  ;;  %1147 = vmatmul.f32.gmra.mxu0 %v3094_v57 }
 0x223   : > { %1222 = vmatmul.f32.gmra.mxu1 %v3371_v41  ;;  %v3540_v41 = vld [vmem:[%s4723_s7] ss:$0 sm:$0xff] }
 0x224   : > { %v3542_v43 = vpop.f32.mrf.mxu2  ;;  %v969_v55 = vadd.f32 %v3540_v41, %v3360_v33  ;;  %v972_v33 = vadd.f32 %v3540_v41, %v3385_v47  ;;  %v975_v15 = vadd.f32 %v3540_v41, %v3413_v3  ;;  %v981_v3 = vadd.f32 %v3540_v41, %v3441_v13 }
 0x225   : > { %1087 = vmatmul.f32.gmra.mxu3 %v3501_v42  ;;  %1150 = vmatmul.f32.gmra.mxu0 %v3098_v60 }
 0x22a   : > { %v3522_v34 = vpop.f32.mrf.mxu0 }
 0x22b   : > { %1225 = vmatmul.f32.gmra.mxu1 %v3399_v59 }
 0x22c   : > { %v3553_v63 = vpop.f32.mrf.mxu2 }
 0x22d   : > { %1153 = vmatmul.f32.gmra.mxu0 %v3102_v62 }
 0x230   : > { %v883_v49 = vpop.f32.mrf.mxu1  ;;  %v3545_v52 = vpop.f32.mrf.mxu3 }
 0x231   : > { %v884_v46 = vadd.f32 %v3534_v39, %v883_v49 }
 0x232   : > { %v3528_v35 = vpop.f32.mrf.mxu0 }
 0x233   : > { %1228 = vmatmul.f32.gmra.mxu1 %v3340_v44  ;;  %v1356_v56 = vadd.f32 %v969_v55, %v884_v46 }
 0x234   : > { %v3568_v49 = vpop.f32.mrf.mxu2 }
 0x235   : > { %1156 = vmatmul.f32.gmra.mxu0 %v3106_v0  ;;  %v2374_v61 = vmul.f32 -1.442695, %v1356_v56 }
 0x237   : > { %2556 = vpow2.f32 %v2374_v61 }
 0x238   : > { %v886_v45 = vpop.f32.mrf.mxu1  ;;  %v3558_v6 = vpop.f32.mrf.mxu3 }
 0x239   : > { %v887_v1 = vadd.f32 %v3534_v39, %v886_v45 }
 0x23a   : > { %v3547_v44 = vpop.f32.mrf.mxu0 }
 0x23b   : > { %1231 = vmatmul.f32.gmra.mxu1 %v3365_v37  ;;  %v1357_v37 = vadd.f32 %v972_v33, %v887_v1 }
 0x23d   : > { %1159 = vmatmul.f32.gmra.mxu0 %v3110_v2  ;;  %v2375_v16 = vmul.f32 -1.442695, %v1357_v37  ;;  %v2557_v24 = vpop.eup %2556 }
 0x23e   : > { %v3573_v47 = vadd.f32 1.0, %v2557_v24 }
 0x23f   : > { %2558 = vpow2.f32 %v2375_v16 }
 0x240   : > { %v889_v59 = vpop.f32.mrf.mxu1  ;;  %v3570_v45 = vpop.f32.mrf.mxu3  ;;  %2560 = vrcp.f32 %v3573_v47  ;;  %vm1497_vm1 = vweird.f32 %v3573_v47 }
 0x241   : > { %v890_v7 = vadd.f32 %v3534_v39, %v889_v59 }
 0x242   : > { %v3556_v4 = vpop.f32.mrf.mxu0 }
 0x243   : > { %1234 = vmatmul.f32.gmra.mxu1 %v3390_v53  ;;  %v1358_v53 = vadd.f32 %v975_v15, %v890_v7  ;;  %v3584_v7 = vpop.f32.mrf.mxu2  ;;  %v881_v0 = vadd.f32 %v3534_v39, %v3556_v4 }
 0x245   : > { %1162 = vmatmul.f32.gmra.mxu0 %v3138_v12  ;;  %v2376_v46 = vmul.f32 -1.442695, %v1358_v53  ;;  %v2559_v33 = vpop.eup %2558  ;;  %v872_v53 = vadd.f32 %v3534_v39, %v3522_v34 }
 0x247   : > { %2562 = vpow2.f32 %v2376_v46 }
 0x248   : > { %v892_v11 = vpop.f32.mrf.mxu1  ;;  %v3588_v13 = vpop.f32.mrf.mxu3 }
 0x249   : > { %v893_v55 = vadd.f32 %v3534_v39, %v892_v11  ;;  %v3586_v11 = vadd.f32 1.0, %v2559_v33 }
 0x24a   : > { %v956_v20 = vpop.f32.mrf.mxu0 }
 0x24b   : > { %1237 = vmatmul.f32.gmra.mxu1 %v3418_v5  ;;  %v978_v5 = vadd.f32 %v3540_v41, %v3430_v8  ;;  %v957_v15 = vadd.f32 %v3540_v41, %v956_v20  ;;  %v3591_v8 = vpop.eup %2560  ;;  %2564 = vrcp.f32 %v3586_v11  ;;  %vm1512_vm4 = vweird.f32 %v3586_v11 }
 0x24c   : > { %v1493_v20 = vmul.f32 %v3591_v8, %v3573_v47  ;;  %vm1498_vm0 = vweird.f32 %v3591_v8 }
 0x24d   : > { %1165 = vmatmul.f32.gmra.mxu0 %v3175_v31  ;;  %v1359_v37 = vadd.f32 %v978_v5, %v893_v55  ;;  %v2563_v55 = vpop.eup %2562  ;;  %vm3707_vm3 = vmor %vm1497_vm1, %vm1498_vm0 }
 0x24e   : > { %v3604_v5 = vadd.f32 1.0, %v2563_v55  ;;  %v1494_v33 = vsub.f32 1.0, %v1493_v20  ;;  %v3629_v55 = vadd.f32 %v3540_v41, %v3507_v48 }
 0x24f   : > { %v2377_v16 = vmul.f32 -1.442695, %v1359_v37  ;;  %v3607_v37 = vpop.f32.mrf.mxu2 }
 0x250   : > { %v895_v56 = vpop.f32.mrf.mxu1  ;;  %v1495_v48 = vmul.f32 %v3591_v8, %v1494_v33  ;;  %vm1527_vm7 = vweird.f32 %v3604_v5 }
 0x251   : > { %v896_v59 = vadd.f32 %v3534_v39, %v895_v56  ;;  %2566 = vpow2.f32 %v2377_v16 }
 0x252   : > { %v959_v61 = vpop.f32.mrf.mxu0  ;;  %2568 = vrcp.f32 %v3604_v5 }
 0x253   : > { %v1360_v1 = vadd.f32 %v981_v3, %v896_v59  ;;  %1240 = vmatmul.f32.gmra.mxu1 %v3432_v9  ;;  %v984_v9 = vadd.f32 %v3540_v41, %v3455_v17  ;;  %v1352_v3 = vadd.f32 %v957_v15, %v872_v53  ;;  %v3611_v53 = vpop.eup %2564 }
 0x254   : > { %vm1513_vm6 = vweird.f32 %v3611_v53 }
 0x255   : > { %1168 = vmatmul.f32.gmra.mxu0 %v3215_v58  ;;  %v2378_v17 = vmul.f32 -1.442695, %v1360_v1  ;;  %v2370_v34 = vmul.f32 -1.442695, %v1352_v3  ;;  %v3620_v1 = vpop.f32.mrf.mxu3  ;;  %v960_v3 = vadd.f32 %v3540_v41, %v959_v61  ;;  %v875_v61 = vadd.f32 %v3534_v39, %v3528_v35  ;;  %vm3769_vm8 = vmor %vm1512_vm4, %vm1513_vm6 }
 0x256   : > { %v1496_v58 = vadd.f32 %v3591_v8, %v1495_v48 }
 0x257   : > { %2570 = vpow2.f32 %v2378_v17  ;;  %v1325_v12 = vpop.f32.mrf.mxu2 }
 0x258   : > { %v898_v24 = vpop.f32.mrf.mxu1  ;;  %2572 = vpow2.f32 %v2370_v34 }
 0x259   : > { %v899_v46 = vadd.f32 %v3534_v39, %v898_v24  ;;  %v987_v24 = vadd.f32 %v3540_v41, %v3466_v25  ;;  %v3625_v25 = vadd.f32 %v3540_v41, %v3498_v40  ;;  %v3646_v40 = vadd.f32 %v3540_v41, %v3512_v50 }
 0x25a   : > { %v3598_v56 = vpop.f32.mrf.mxu0  ;;  %v1508_v50 = vmul.f32 %v3611_v53, %v3586_v11 }
 0x25b   : > { %v1361_v59 = vadd.f32 %v984_v9, %v899_v46  ;;  %1243 = vmatmul.f32.gmra.mxu1 %v3443_v14  ;;  %v990_v9 = vadd.f32 %v3540_v41, %v3477_v28  ;;  %v3617_v14 = vadd.f32 %v3540_v41, %v3488_v36  ;;  %v2567_v46 = vpop.eup %2566  ;;  %v3634_v28 = vld [vmem:[%s4723_s7 + $0x2] ss:$0 sm:$0xff]  ;;  %v3639_v36 = vld [vmem:[%s4722_s6 + $0x1] ss:$0 sm:$0xff]  ;;  %v963_v51 = vadd.f32 %v3540_v41, %v3598_v56 }
 0x25c   : > { %v3660_v17 = vadd.f32 %v3634_v28, %v3526_v29  ;;  %v3666_v34 = vadd.f32 %v3634_v28, %v3542_v43  ;;  %v3668_v33 = vadd.f32 1.0, %v2567_v46  ;;  %v1044_v35 = vadd.f32 %v3639_v36, %v3545_v52  ;;  %v3694_v52 = vld [vmem:[%s4723_s7 + $0x1] ss:$0 sm:$0xff] }
 0x25d   : > { %1171 = vmatmul.f32.gmra.mxu0 %v3249_v10  ;;  %v3654_v10 = vadd.f32 %v3634_v28, %v3518_v26  ;;  %v1503_v26 = vand.u32 2147483648, %v3573_v47  ;;  %v3677_v29 = vadd.f32 %v3639_v36, %v3558_v6  ;;  %v1353_v43 = vadd.f32 %v960_v3, %v875_v61 }
 0x25e   : > { %v878_v46 = vadd.f32 %v3534_v39, %v3547_v44  ;;  %v3698_v6 = vadd.f32 %v3639_v36, %v3570_v45  ;;  %v1509_v44 = vsub.f32 1.0, %v1508_v50  ;;  %v2379_v3 = vmul.f32 -1.442695, %v1361_v59 }
 0x25f   : > { %2574 = vrcp.f32 %v3668_v33  ;;  %v1504_v31 = vor.u32 1.1754944e-38, %v1503_v26  ;;  %v2371_v45 = vmul.f32 -1.442695, %v1353_v43  ;;  %v1518_v59 = vand.u32 2147483648, %v3586_v11 }
 0x260   : > { %v901_v15 = vpop.f32.mrf.mxu1  ;;  %v1500_v26 = vsel %vm3707_vm3, %v3591_v8, %v1496_v58  ;;  %v1510_v54 = vmul.f32 %v3611_v53, %v1509_v44  ;;  %2576 = vpow2.f32 %v2379_v3  ;;  %v3735_v58 = vadd.f32 %v3634_v28, %v3584_v7 }
 0x261   : > { %v902_v16 = vadd.f32 %v3534_v39, %v901_v15  ;;  %2578 = vpow2.f32 %v2371_v45  ;;  %v1519_v7 = vor.u32 1.1754944e-38, %v1518_v59  ;;  %v3756_v3 = vadd.f32 %v3634_v28, %v3607_v37 }
 0x262   : > { %v3642_v20 = vpop.f32.mrf.mxu0  ;;  %vm1542_vm11 = vweird.f32 %v3668_v33 }
 0x263   : > { %v3649_v15 = vadd.f32 %v987_v24, %v902_v16  ;;  %1246 = vmatmul.f32.gmra.mxu1 %v3457_v19  ;;  %v1501_v19 = vand.u32 2147483647, %v3573_v47  ;;  %v3681_v24 = vadd.f32 %v3634_v28, %v3553_v63  ;;  %v3683_v16 = vpop.eup %2568  ;;  %v1516_v47 = vand.u32 2147483647, %v3586_v11 }
 0x264   : > { %v2571_v63 = vpop.eup %2570  ;;  %v1523_v50 = vmul.f32 %v3683_v16, %v3604_v5  ;;  %vm1528_vm10 = vweird.f32 %v3683_v16 }
 0x265   : > { %1174 = vmatmul.f32.gmra.mxu0 %v3268_v18  ;;  %v1317_v18 = vadd.f32 %v3634_v28, %v3568_v49  ;;  %v2573_v49 = vpop.eup %2572  ;;  %vm3702_vm2 = vcmp.eq.f32.partialorder %v1501_v19, 8.507059e+37  ;;  %v3718_v62 = vadd.f32 1.0, %v2571_v63  ;;  %vm3742_vm5 = vcmp.eq.f32.partialorder %v1516_v47, 8.507059e+37  ;;  %vm3823_vm12 = vmor %vm1527_vm7, %vm1528_vm10 }
 0x266   : > { %v3726_v57 = vadd.f32 1.0, %v2573_v49  ;;  %v1524_v56 = vsub.f32 1.0, %v1523_v50  ;;  %v1505_v4 = vsel %vm3702_vm2, %v1504_v31, %v1500_v26  ;;  %v1531_v49 = vand.u32 2147483647, %v3604_v5  ;;  %v1328_v50 = vpop.f32.mrf.mxu2 }
 0x267   : > { %2580 = vrcp.f32 %v3718_v62  ;;  %v3765_v47 = vmul.f32 %v1505_v4, %v1317_v18  ;;  %v2380_v59 = vmul.f32 -1.442695, %v3649_v15  ;;  %v3781_v18 = vadd.f32 %v3639_v36, %v3620_v1 }
 0x268   : > { %v904_v61 = vpop.f32.mrf.mxu1  ;;  %2582 = vrcp.f32 %v3726_v57  ;;  %v1525_v45 = vmul.f32 %v3683_v16, %v1524_v56  ;;  %v966_v15 = vadd.f32 %v3540_v41, %v3642_v20  ;;  %vm3792_vm9 = vcmp.eq.f32.partialorder %v1531_v49, 8.507059e+37 }
 0x269   : > { %v905_v2 = vadd.f32 %v3534_v39, %v904_v61  ;;  %v3720_v61 = vpop.f32.mrf.mxu3  ;;  %v3797_v1 = vadd.f32 %v3634_v28, %v1325_v12  ;;  %v1546_v49 = vand.u32 2147483647, %v3668_v33  ;;  %vm1557_vm15 = vweird.f32 %v3718_v62 }
 0x26a   : > { %v1130_v19 = vpop.f32.mrf.mxu0  ;;  %v1355_v12 = vadd.f32 %v966_v15, %v881_v0  ;;  %v3817_v8 = vadd.f32 %v3639_v36, %v3720_v61  ;;  %vm1437_vm0 = vweird.f32 %v3726_v57 }
 0x26b   : > { %v3722_v60 = vadd.f32 %v990_v9, %v905_v2  ;;  %v1131_v43 = vadd.f32 %v3694_v52, %v1130_v19  ;;  %1249 = vmatmul.f32.gmra.mxu1 %v3468_v21  ;;  %v3740_v21 = vadd.f32 %v3639_v36, %v3588_v13  ;;  %v3746_v9 = vpop.eup %2574  ;;  %v1511_v13 = vadd.f32 %v3611_v53, %v1510_v54 }
 0x26c   : > { %v2577_v48 = vpop.eup %2576  ;;  %v1533_v54 = vand.u32 2147483648, %v3604_v5  ;;  %v1548_v5 = vand.u32 2147483648, %v3668_v33  ;;  %vm3843_vm13 = vcmp.eq.f32.partialorder %v1546_v49, 8.507059e+37  ;;  %vm1543_vm14 = vweird.f32 %v3746_v9 }
 0x26d   : > { %v1672_v2 = vadd.f32 %v1131_v43, %v1044_v35  ;;  %v1354_v35 = vadd.f32 %v963_v51, %v878_v46  ;;  %v1538_v51 = vmul.f32 %v3746_v9, %v3668_v33  ;;  %v2579_v43 = vpop.eup %2578  ;;  %v1515_v11 = vsel %vm3769_vm8, %v3611_v53, %v1511_v13  ;;  %vm3878_vm1 = vmor %vm1542_vm11, %vm1543_vm14 }
 0x26e   : > { %v3788_v56 = vpop.eup %2580  ;;  %v1526_v53 = vadd.f32 %v3683_v16, %v1525_v45  ;;  %v1534_v41 = vor.u32 1.1754944e-38, %v1533_v54  ;;  %v3812_v54 = vadd.f32 1.0, %v2579_v43 }
 0x26f   : > { %v2386_v63 = vmul.f32 -1.442695, %v1672_v2  ;;  %v2372_v2 = vmul.f32 -1.442695, %v1354_v35  ;;  %v1539_v20 = vsub.f32 1.0, %v1538_v51  ;;  %v1520_v35 = vsel %vm3742_vm5, %v1519_v7, %v1515_v11 }
 0x270   : > { %v907_v44 = vpop.f32.mrf.mxu1  ;;  %v1530_v51 = vsel %vm3823_vm12, %v3683_v16, %v1526_v53  ;;  %v2373_v16 = vmul.f32 -1.442695, %v1355_v12  ;;  %v3848_v11 = vadd.f32 %v3634_v28, %v1328_v50  ;;  %v1561_v50 = vand.u32 2147483647, %v3718_v62 }
 0x271   : > { %2584 = vpow2.f32 %v2386_v63  ;;  %v908_v31 = vadd.f32 %v3534_v39, %v907_v44  ;;  %v3800_v44 = vpop.eup %2582  ;;  %v1535_v15 = vsel %vm3792_vm9, %v1534_v41, %v1530_v51  ;;  %v1549_v41 = vor.u32 1.1754944e-38, %v1548_v5 }
 0x272   : > { %v1133_v46 = vpop.f32.mrf.mxu0  ;;  %2586 = vpow2.f32 %v2380_v59  ;;  %v1433_v61 = vmul.f32 %v3800_v44, %v3726_v57  ;;  %v3835_v59 = vmul.f32 %v1520_v35, %v3735_v58  ;;  %vm3892_vm2 = vcmp.eq.f32.partialorder %v1561_v50, 8.507059e+37 }
 0x273   : > { %v3775_v19 = vadd.f32 %v3617_v14, %v908_v31  ;;  %v1134_v26 = vadd.f32 %v3694_v52, %v1133_v46  ;;  %1252 = vmatmul.f32.gmra.mxu1 %v3479_v32  ;;  %v3790_v14 = vadd.f32 1.0, %v2577_v48  ;;  %v1061_v32 = vpop.f32.mrf.mxu3  ;;  %2588 = vpow2.f32 %v2372_v2 }
 0x274   : > { %v1553_v48 = vmul.f32 %v3788_v56, %v3718_v62  ;;  %v1540_v46 = vmul.f32 %v3746_v9, %v1539_v20  ;;  %v3861_v4 = vadd.f32 %v3639_v36, %v1061_v32  ;;  %vm1438_vm3 = vweird.f32 %v3800_v44 }
 0x275   : > { %v1673_v63 = vadd.f32 %v1134_v26, %v3677_v29  ;;  %2590 = vrcp.f32 %v3790_v14  ;;  %vm1558_vm4 = vweird.f32 %v3788_v56  ;;  %vm1572_vm7 = vweird.f32 %v3790_v14  ;;  %vm3954_vm8 = vmor %vm1437_vm0, %vm1438_vm3 }
 0x276   : > { %v1554_v2 = vsub.f32 1.0, %v1553_v48  ;;  %v1541_v20 = vadd.f32 %v3746_v9, %v1540_v46  ;;  %v3866_v48 = vmul.f32 %v1535_v15, %v3756_v3  ;;  %v1563_v3 = vand.u32 2147483648, %v3718_v62  ;;  %vm3931_vm6 = vmor %vm1557_vm15, %vm1558_vm4 }
 0x277   : > { %v2585_v13 = vpop.eup %2584  ;;  %v2387_v31 = vmul.f32 -1.442695, %v1673_v63  ;;  %v1331_v63 = vpop.f32.mrf.mxu2  ;;  %vm1452_vm11 = vweird.f32 %v3812_v54 }
 0x278   : > { %v3808_v29 = vadd.f32 1.0, %v2585_v13  ;;  %v910_v45 = vpop.f32.mrf.mxu1  ;;  %v2587_v58 = vpop.eup %2586  ;;  %v1434_v13 = vsub.f32 1.0, %v1433_v61  ;;  %v1555_v0 = vmul.f32 %v3788_v56, %v1554_v2  ;;  %v3884_v46 = vadd.f32 %v3634_v28, %v1331_v63 }
 0x279   : > { %v911_v7 = vadd.f32 %v3534_v39, %v910_v45  ;;  %2592 = vpow2.f32 %v2387_v31  ;;  %v2589_v53 = vpop.eup %2588  ;;  %v1443_v31 = vand.u32 2147483648, %v3726_v57  ;;  %v3868_v45 = vadd.f32 1.0, %v2587_v58 }
 0x27a   : > { %v1136_v37 = vpop.f32.mrf.mxu0  ;;  %2594 = vrcp.f32 %v3808_v29  ;;  %v1545_v5 = vsel %vm3878_vm1, %v3746_v9, %v1541_v20  ;;  %v1435_v58 = vmul.f32 %v3800_v44, %v1434_v13  ;;  %v3909_v63 = vadd.f32 1.0, %v2589_v53 }
 0x27b   : > { %v3840_v26 = vadd.f32 %v3625_v25, %v911_v7  ;;  %1255 = vmatmul.f32.gmra.mxu1 %v3485_v23  ;;  %v1137_v25 = vadd.f32 %v3694_v52, %v1136_v37  ;;  %v1441_v23 = vand.u32 2147483647, %v3726_v57  ;;  %2596 = vrcp.f32 %v3812_v54  ;;  %v3858_v35 = vpop.eup %2590  ;;  %v1064_v49 = vpop.f32.mrf.mxu3 }
 0x27c   : > { %2598 = vpow2.f32 %v2373_v16  ;;  %v2381_v16 = vmul.f32 -1.442695, %v3722_v60  ;;  %v1568_v15 = vmul.f32 %v3858_v35, %v3790_v14  ;;  %v1556_v20 = vadd.f32 %v3788_v56, %v1555_v0 }
 0x27d   : > { %v1674_v37 = vadd.f32 %v1137_v25, %v3698_v6  ;;  %2600 = vrcp.f32 %v3868_v45  ;;  %vm3915_vm5 = vcmp.eq.f32.partialorder %v1441_v23, 8.507059e+37  ;;  %v1564_v13 = vor.u32 1.1754944e-38, %v1563_v3 }
 0x27e   : > { %2602 = vpow2.f32 %v2381_v16  ;;  %v1436_v51 = vadd.f32 %v3800_v44, %v1435_v58  ;;  %v3925_v0 = vadd.f32 %v3639_v36, %v1064_v49  ;;  %v1569_v23 = vsub.f32 1.0, %v1568_v15 }
 0x27f   : > { %v2593_v12 = vpop.eup %2592  ;;  %v1560_v62 = vsel %vm3931_vm6, %v3788_v56, %v1556_v20  ;;  %v1576_v15 = vand.u32 2147483647, %v3790_v14  ;;  %vm1573_vm10 = vweird.f32 %v3858_v35  ;;  %vm1757_vm14 = vweird.f32 %v3808_v29 }
 0x280   : > { %v913_v7 = vpop.f32.mrf.mxu1  ;;  %v3872_v32 = vpop.eup %2594  ;;  %v3899_v6 = vadd.f32 1.0, %v2593_v12  ;;  %v1565_v57 = vsel %vm3892_vm2, %v1564_v13, %v1560_v62  ;;  %v3991_v13 = vld [vmem:[%s4722_s6 + $0x2] ss:$0 sm:$0xff]  ;;  %v1593_v62 = vand.u32 2147483648, %v3868_v45  ;;  %vm4025_vm15 = vmor %vm1572_vm7, %vm1573_vm10  ;;  %vm1587_vm0 = vweird.f32 %v3868_v45 }
 0x281   : > { %v914_v61 = vadd.f32 %v3534_v39, %v913_v7  ;;  %v3907_v60 = vpop.eup %2596  ;;  %v1753_v25 = vmul.f32 %v3872_v32, %v3808_v29  ;;  %v1578_v7 = vand.u32 2147483648, %v3790_v14  ;;  %vm1758_vm12 = vweird.f32 %v3872_v32 }
 0x282   : > { %v1139_v2 = vpop.f32.mrf.mxu0  ;;  %v2599_v53 = vpop.eup %2598  ;;  %2604 = vrcp.f32 %v3899_v6  ;;  %v1448_v3 = vmul.f32 %v3907_v60, %v3812_v54  ;;  %vm1453_vm9 = vweird.f32 %v3907_v60  ;;  %vm4037_vm1 = vmor %vm1757_vm14, %vm1758_vm12 }
 0x283   : > { %v3904_v9 = vadd.f32 %v3629_v55, %v914_v61  ;;  %1258 = vmatmul.f32.gmra.mxu1 %v3493_v38  ;;  %v1550_v55 = vsel %vm3843_vm13, %v1549_v41, %v1545_v5  ;;  %v2388_v38 = vmul.f32 -1.442695, %v1674_v37  ;;  %v1140_v12 = vadd.f32 %v3694_v52, %v1139_v2  ;;  %v1334_v41 = vpop.f32.mrf.mxu2  ;;  %v1067_v16 = vpop.f32.mrf.mxu3  ;;  %vm4057_vm3 = vmor %vm1452_vm11, %vm1453_vm9 }
 0x284   : > { %v1444_v61 = vor.u32 1.1754944e-38, %v1443_v31  ;;  %2606 = vrcp.f32 %v3909_v63  ;;  %v3940_v49 = vmul.f32 %v1550_v55, %v3797_v1  ;;  %v1754_v31 = vsub.f32 1.0, %v1753_v25  ;;  %v3958_v56 = vpop.eup %2600 }
 0x285   : > { %v3945_v5 = vadd.f32 1.0, %v2599_v53  ;;  %2608 = vpow2.f32 %v2388_v38  ;;  %v1675_v2 = vadd.f32 %v1140_v12, %v3740_v21  ;;  %v3961_v25 = vor.u32 1.1754944e-38, %v1578_v7  ;;  %v2603_v53 = vpop.eup %2602 }
 0x286   : > { %v3964_v20 = vadd.f32 %v3634_v28, %v1334_v41  ;;  %v1570_v55 = vmul.f32 %v3858_v35, %v1569_v23  ;;  %v1449_v12 = vsub.f32 1.0, %v1448_v3  ;;  %v1755_v7 = vmul.f32 %v3872_v32, %v1754_v31 }
 0x287   : > { %v3979_v43 = vadd.f32 %v3639_v36, %v1067_v16  ;;  %2610 = vrcp.f32 %v3945_v5  ;;  %v3999_v41 = vmul.f32 %v1565_v57, %v3848_v11  ;;  %v2382_v3 = vmul.f32 -1.442695, %v3775_v19 }
 0x288   : > { %v916_v37 = vpop.f32.mrf.mxu1  ;;  %v3983_v33 = vpop.eup %2604  ;;  %v1591_v31 = vand.u32 2147483647, %v3868_v45  ;;  %v4004_v16 = vadd.f32 1.0, %v2603_v53  ;;  %v1756_v1 = vadd.f32 %v3872_v32, %v1755_v7  ;;  %vm4015_vm13 = vcmp.eq.f32.partialorder %v1576_v15, 8.507059e+37 }
 0x289   : > { %v917_v58 = vadd.f32 %v3534_v39, %v916_v37  ;;  %v1440_v39 = vsel %vm3954_vm8, %v3800_v44, %v1436_v51  ;;  %v1761_v15 = vand.u32 2147483647, %v3808_v29  ;;  %vm1773_vm8 = vweird.f32 %v3983_v33 }
 0x28a   : > { %v1142_v21 = vpop.f32.mrf.mxu0  ;;  %v1445_v51 = vsel %vm3915_vm5, %v1444_v61, %v1440_v39  ;;  %v3996_v23 = vpop.eup %2606  ;;  %v1450_v61 = vmul.f32 %v3907_v60, %v1449_v12  ;;  %vm4067_vm4 = vcmp.eq.f32.partialorder %v1591_v31, 8.507059e+37  ;;  %vm1588_vm5 = vweird.f32 %v3958_v56 }
 0x28b   : > { %v3973_v38 = vadd.f32 %v3646_v40, %v917_v58  ;;  %1261 = vmatmul.f32.gmra.mxu1 %v3501_v42  ;;  %v1143_v44 = vadd.f32 %v3694_v52, %v1142_v21  ;;  %v1583_v42 = vmul.f32 %v3958_v56, %v3868_v45  ;;  %v2389_v40 = vmul.f32 -1.442695, %v1675_v2  ;;  %v2609_v37 = vpop.eup %2608  ;;  %vm4091_vm7 = vmor %vm1587_vm0, %vm1588_vm5 }
 0x28c   : > { %v1571_v2 = vadd.f32 %v3858_v35, %v1570_v55  ;;  %v1768_v58 = vmul.f32 %v3983_v33, %v3899_v6  ;;  %v1992_v19 = vmul.f32 %v1445_v51, %v3654_v10  ;;  %v1763_v21 = vand.u32 2147483648, %v3808_v29 }
 0x28d   : > { %v1676_v50 = vadd.f32 %v1143_v44, %v3781_v18  ;;  %v1584_v57 = vsub.f32 1.0, %v1583_v42  ;;  %2612 = vpow2.f32 %v2389_v40  ;;  %v4029_v10 = vadd.f32 1.0, %v2609_v37  ;;  %v4032_v53 = vpop.eup %2610 }
 0x28e   : > { %2614 = vpow2.f32 %v2382_v3  ;;  %v1451_v40 = vadd.f32 %v3907_v60, %v1450_v61  ;;  %v1769_v29 = vsub.f32 1.0, %v1768_v58  ;;  %v1575_v51 = vsel %vm4025_vm15, %v3858_v35, %v1571_v2 }
 0x28f   : > { %v2390_v7 = vmul.f32 -1.442695, %v1676_v50  ;;  %2616 = vrcp.f32 %v4004_v16  ;;  %v1760_v3 = vsel %vm4037_vm1, %v3872_v32, %v1756_v1  ;;  %v1585_v37 = vmul.f32 %v3958_v56, %v1584_v57 }
 0x290   : > { %v1217_v11 = vpop.f32.mrf.mxu1  ;;  %v1764_v50 = vor.u32 1.1754944e-38, %v1763_v21  ;;  %vm1762_vm2 = vcmp.eq.f32.partialorder %v1761_v15, 8.507059e+37  ;;  %v1456_v35 = vand.u32 2147483647, %v3812_v54  ;;  %v1458_v32 = vand.u32 2147483648, %v3812_v54 }
 0x291   : > { %v1218_v18 = vadd.f32 %v3991_v13, %v1217_v11  ;;  %v1770_v21 = vmul.f32 %v3983_v33, %v1769_v29  ;;  %v1586_v54 = vadd.f32 %v3958_v56, %v1585_v37  ;;  %v2383_v29 = vmul.f32 -1.442695, %v3840_v26 }
 0x292   : > { %v1145_v12 = vpop.f32.mrf.mxu0  ;;  %v1765_v58 = vsel %vm1762_vm2, %v1764_v50, %v1760_v3  ;;  %v1459_v15 = vor.u32 1.1754944e-38, %v1458_v32  ;;  %vm1457_vm6 = vcmp.eq.f32.partialorder %v1456_v35, 8.507059e+37  ;;  %v1608_v3 = vand.u32 2147483648, %v4004_v16 }
 0x293   : > { %v2008_v14 = vadd.f32 %v1992_v19, %v1218_v18  ;;  %v1146_v42 = vadd.f32 %v3694_v52, %v1145_v12  ;;  %v2613_v2 = vpop.eup %2612  ;;  %v1594_v18 = vor.u32 1.1754944e-38, %v1593_v62  ;;  %v1070_v12 = vpop.f32.mrf.mxu3  ;;  %v2040_v44 = vsub.f32 1.0, %v1765_v58 }
 0x294   : > { %v2615_v19 = vpop.eup %2614  ;;  %v4078_v31 = vadd.f32 1.0, %v2613_v2  ;;  %v1771_v61 = vadd.f32 %v3983_v33, %v1770_v21  ;;  %v1778_v35 = vand.u32 2147483648, %v3899_v6  ;;  %v1590_v32 = vsel %vm4091_vm7, %v3958_v56, %v1586_v54 }
 0x295   : > { %2618 = vtanh.f32 %v2008_v14  ;;  %v1677_v11 = vadd.f32 %v1146_v42, %v3817_v8  ;;  %v1455_v8 = vsel %vm4057_vm3, %v3907_v60, %v1451_v40  ;;  %v1580_v60 = vsel %vm4015_vm13, %v3961_v25, %v1575_v51  ;;  %v2716_v51 = vld [vmem:[%s2914_s14] sm:$0xff] }
 0x296   : > { %2620 = vrcp.f32 %v4029_v10  ;;  %v1460_v62 = vsel %vm1457_vm6, %v1459_v15, %v1455_v8  ;;  %v4080_v40 = vadd.f32 1.0, %v2615_v19  ;;  %vm1772_vm9 = vweird.f32 %v3899_v6  ;;  %v1337_v19 = vpop.f32.mrf.mxu2 }
 0x297   : > { %2622 = vpow2.f32 %v2390_v7  ;;  %v2391_v1 = vmul.f32 -1.442695, %v1677_v11  ;;  %v4073_v7 = vpop.eup %2616  ;;  %v2072_v11 = vmul.f32 %v2716_v51, %v1765_v58  ;;  %v1993_v45 = vmul.f32 %v1460_v62, %v3660_v17  ;;  %vm4109_vm10 = vmor %vm1772_vm9, %vm1773_vm8 }
 0x298   : > { %v1220_v55 = vpop.f32.mrf.mxu1  ;;  %v1598_v21 = vmul.f32 %v4073_v7, %v4004_v16  ;;  %v1595_v54 = vsel %vm4067_vm4, %v1594_v18, %v1590_v32  ;;  %v4131_v57 = vadd.f32 %v3634_v28, %v1337_v19  ;;  %v1606_v25 = vand.u32 2147483647, %v4004_v16 }
 0x299   : > { %2624 = vpow2.f32 %v2391_v1  ;;  %v1221_v37 = vadd.f32 %v3991_v13, %v1220_v55  ;;  %v1776_v1 = vand.u32 2147483647, %v3899_v6  ;;  %v1463_v28 = vmul.f32 %v3996_v23, %v3909_v63 }
 0x29a   : > { %v1148_v14 = vpop.f32.mrf.mxu0  ;;  %2626 = vrcp.f32 %v4078_v31  ;;  %vm1468_vm12 = vweird.f32 %v3996_v23  ;;  %vm1467_vm13 = vweird.f32 %v3909_v63  ;;  %vm1787_vm1 = vweird.f32 %v4029_v10 }
 0x29b   : > { %v2619_v42 = vpop.eup %2618  ;;  %v1149_v2 = vadd.f32 %v3694_v52, %v1148_v14  ;;  %2628 = vpow2.f32 %v2383_v29  ;;  %v2009_v17 = vadd.f32 %v1993_v45, %v1221_v37  ;;  %vm1777_vm11 = vcmp.eq.f32.partialorder %v1776_v1, 8.507059e+37  ;;  %vm1469_vm14 = vmor %vm1467_vm13, %vm1468_vm12 }
 0x29c   : > { %v4085_v50 = vpop.eup %2620  ;;  %v2056_v39 = vmul.f32 %v2619_v42, %v2040_v44  ;;  %v1775_v44 = vsel %vm4109_vm10, %v3983_v33, %v1771_v61  ;;  %v1779_v42 = vor.u32 1.1754944e-38, %v1778_v35  ;;  %v4134_v37 = vmul.f32 %v1580_v60, %v3884_v46  ;;  %v1073_v33 = vpop.f32.mrf.mxu3 }
 0x29d   : > { %v2623_v26 = vpop.eup %2622  ;;  %v1678_v55 = vadd.f32 %v1149_v2, %v3861_v4  ;;  %v1783_v15 = vmul.f32 %v4085_v50, %v4029_v10  ;;  %2630 = vtanh.f32 %v2009_v17  ;;  %v4128_v4 = vadd.f32 %v3639_v36, %v1070_v12 }
 0x29e   : > { %v2088_v58 = vadd.f32 %v2072_v11, %v2056_v39  ;;  %v4118_v6 = vadd.f32 1.0, %v2623_v26  ;;  %2632 = vrcp.f32 %v4080_v40  ;;  %v1780_v39 = vsel %vm1777_vm11, %v1779_v42, %v1775_v44 }
 0x29f   : > { %v2625_v8 = vpop.eup %2624  ;;  %v2392_v29 = vmul.f32 -1.442695, %v1678_v55  ;;  %v4140_v11 = vmul.f32 %v1595_v54, %v3964_v20  ;;  %v4142_v12 = vor.u32 1.1754944e-38, %v1608_v3  ;;  %v1784_v46 = vsub.f32 1.0, %v1783_v15 }
 0x2a0   : > { %2104 = vst [vmem:[%s2919_s15] sm:$0xff] %v2088_v58  ;;  %v1223_v62 = vpop.f32.mrf.mxu1  ;;  %v4124_v14 = vadd.f32 1.0, %v2625_v8  ;;  %v4137_v51 = vpop.eup %2626  ;;  %v2384_v60 = vmul.f32 -1.442695, %v3904_v9  ;;  %v1599_v26 = vsub.f32 1.0, %v1598_v21  ;;  %v4150_v35 = vadd.f32 %v3639_v36, %v1073_v33 }
 0x2a1   : > { %2634 = vpow2.f32 %v2392_v29  ;;  %v2629_v61 = vpop.eup %2628  ;;  %v2041_v32 = vsub.f32 1.0, %v1780_v39  ;;  %v1464_v3 = vsub.f32 1.0, %v1463_v28  ;;  %v1798_v2 = vmul.f32 %v4137_v51, %v4078_v31 }
 0x2a2   : > { %v1151_v18 = vpop.f32.mrf.mxu0  ;;  %2636 = vrcp.f32 %v4118_v6  ;;  %v2073_v1 = vmul.f32 %v1780_v39, %v3295_v22  ;;  %v1473_v9 = vand.u32 2147483648, %v3909_v63  ;;  %v1471_v21 = vand.u32 2147483647, %v3909_v63 }
 0x2a3   : > { %2638 = vrcp.f32 %v4124_v14  ;;  %v2631_v45 = vpop.eup %2630  ;;  %v1465_v36 = vmul.f32 %v3996_v23, %v1464_v3  ;;  %v4163_v17 = vadd.f32 1.0, %v2629_v61  ;;  %v1785_v55 = vmul.f32 %v4085_v50, %v1784_v46 }
 0x2a4   : > { %v4158_v8 = vpop.eup %2632  ;;  %v2057_v19 = vmul.f32 %v2631_v45, %v2041_v32  ;;  %2640 = vpow2.f32 %v2384_v60  ;;  %v1600_v22 = vmul.f32 %v4073_v7, %v1599_v26  ;;  %v1799_v28 = vsub.f32 1.0, %v1798_v2 }
 0x2a5   : > { %v1466_v42 = vadd.f32 %v3996_v23, %v1465_v36  ;;  %v4181_v61 = vmul.f32 %v4158_v8, %v4080_v40  ;;  %v1474_v46 = vor.u32 1.1754944e-38, %v1473_v9  ;;  %v1152_v60 = vadd.f32 %v3694_v52, %v1151_v18 }
 0x2a6   : > { %v2089_v54 = vadd.f32 %v2073_v1, %v2057_v19  ;;  %v1224_v63 = vadd.f32 %v3991_v13, %v1223_v62  ;;  %vm1472_vm15 = vcmp.eq.f32.partialorder %v1471_v21, 8.507059e+37  ;;  %v1786_v3 = vadd.f32 %v4085_v50, %v1785_v55 }
 0x2a7   : > { %v2635_v56 = vpop.eup %2634  ;;  %v1470_v26 = vsel %vm1469_vm14, %v3996_v23, %v1466_v42  ;;  %vm1788_vm0 = vweird.f32 %v4085_v50  ;;  %v1679_v45 = vadd.f32 %v1152_v60, %v3925_v0  ;;  %v1793_v2 = vand.u32 2147483648, %v4029_v10 }
 0x2a8   : > { %v4167_v15 = vpop.eup %2636  ;;  %v4169_v44 = vadd.f32 1.0, %v2635_v56  ;;  %v4173_v29 = vpop.f32.mrf.mxu1  ;;  %2105 = vst [vmem:[%s2919_s15 + $0x8] sm:$0xff] %v2089_v54  ;;  %v1475_v32 = vsel %vm1472_vm15, %v1474_v46, %v1470_v26  ;;  %v1791_v23 = vand.u32 2147483647, %v4029_v10  ;;  %vm1802_vm2 = vweird.f32 %v4078_v31  ;;  %vm4209_vm3 = vmor %vm1787_vm1, %vm1788_vm0 }
 0x2a9   : > { %v4177_v39 = vpop.eup %2638  ;;  %v1813_v18 = vmul.f32 %v4167_v15, %v4118_v6  ;;  %v1994_v62 = vmul.f32 %v1475_v32, %v3666_v34  ;;  %v2393_v19 = vmul.f32 -1.442695, %v1679_v45  ;;  %v1808_v0 = vand.u32 2147483648, %v4078_v31 }
 0x2aa   : > { %v4175_v33 = vpop.f32.mrf.mxu0  ;;  %2642 = vrcp.f32 %v4169_v44  ;;  %v1828_v1 = vmul.f32 %v4177_v39, %v4124_v14  ;;  %v4199_v9 = vpop.eup %2640  ;;  %v4207_v36 = vadd.f32 %v4073_v7, %v1600_v22  ;;  %v1800_v56 = vmul.f32 %v4137_v51, %v1799_v28 }
 0x2ab   : > { %2644 = vrcp.f32 %v4163_v17  ;;  %v2010_v34 = vadd.f32 %v1994_v62, %v1224_v63  ;;  %v1790_v55 = vsel %vm4209_vm3, %v4085_v50, %v1786_v3  ;;  %v1478_v10 = vmul.f32 %v4032_v53, %v3945_v5 }
 0x2ac   : > { %2646 = vpow2.f32 %v2393_v19  ;;  %v1814_v42 = vsub.f32 1.0, %v1813_v18  ;;  %v1829_v22 = vsub.f32 1.0, %v1828_v1  ;;  %v1794_v46 = vor.u32 1.1754944e-38, %v1793_v2 }
 0x2ad   : > { %2648 = vtanh.f32 %v2010_v34  ;;  %v1823_v60 = vand.u32 2147483648, %v4118_v6  ;;  %v1838_v63 = vand.u32 2147483648, %v4124_v14  ;;  %vm1792_vm4 = vcmp.eq.f32.partialorder %v1791_v23, 8.507059e+37 }
 0x2ae   : > { %v1479_v28 = vsub.f32 1.0, %v1478_v10  ;;  %vm1817_vm5 = vweird.f32 %v4118_v6  ;;  %v1795_v26 = vsel %vm1792_vm4, %v1794_v46, %v1790_v55  ;;  %vm1483_vm6 = vweird.f32 %v4032_v53 }
 0x2af   : > { %v1488_v32 = vand.u32 2147483648, %v3945_v5  ;;  %v1486_v1 = vand.u32 2147483647, %v3945_v5  ;;  %v1801_v62 = vadd.f32 %v4137_v51, %v1800_v56  ;;  %vm1803_vm7 = vweird.f32 %v4137_v51 }
 0x2b0   : > { %v4219_v54 = vpop.eup %2642  ;;  %v1229_v3 = vpop.f32.mrf.mxu1  ;;  %v1480_v18 = vmul.f32 %v4032_v53, %v1479_v28  ;;  %v1815_v23 = vmul.f32 %v4167_v15, %v1814_v42  ;;  %v1830_v19 = vmul.f32 %v4177_v39, %v1829_v22  ;;  %vm1482_vm8 = vweird.f32 %v3945_v5  ;;  %vm4250_vm10 = vmor %vm1802_vm2, %vm1803_vm7 }
 0x2b1   : > { %v1843_v50 = vmul.f32 %v4219_v54, %v4169_v44  ;;  %v4228_v2 = vpop.eup %2644  ;;  %v1806_v21 = vand.u32 2147483647, %v4078_v31  ;;  %v2042_v55 = vsub.f32 1.0, %v1795_v26  ;;  %v2074_v10 = vmul.f32 %v1795_v26, %v3306_v27  ;;  %vm1484_vm9 = vmor %vm1482_vm8, %vm1483_vm6 }
 0x2b2   : > { %v1157_v45 = vpop.f32.mrf.mxu0  ;;  %v2647_v34 = vpop.eup %2646  ;;  %v1227_v46 = vadd.f32 %v3991_v13, %v4173_v29  ;;  %v1481_v28 = vadd.f32 %v4032_v53, %v1480_v18  ;;  %v1489_v22 = vor.u32 1.1754944e-38, %v1488_v32  ;;  %v1155_v27 = vadd.f32 %v3694_v52, %v4175_v33 }
 0x2b3   : > { %v2649_v56 = vpop.eup %2648  ;;  %v1844_v42 = vsub.f32 1.0, %v1843_v50  ;;  %v4244_v20 = vadd.f32 1.0, %v2647_v34  ;;  %v4256_v29 = vpop.f32.mrf.mxu3  ;;  %vm1832_vm11 = vweird.f32 %v4124_v14  ;;  %vm1487_vm12 = vcmp.eq.f32.partialorder %v1486_v1, 8.507059e+37 }
 0x2b4   : > { %v2058_v26 = vmul.f32 %v2649_v56, %v2042_v55  ;;  %v1485_v50 = vsel %vm1484_vm9, %v4032_v53, %v1481_v28  ;;  %v1805_v31 = vsel %vm4250_vm10, %v4137_v51, %v1801_v62  ;;  %vm1807_vm13 = vcmp.eq.f32.partialorder %v1806_v21, 8.507059e+37 }
 0x2b5   : > { %2650 = vrcp.f32 %v4244_v20  ;;  %v1490_v32 = vsel %vm1487_vm12, %v1489_v22, %v1485_v50  ;;  %v1809_v18 = vor.u32 1.1754944e-38, %v1808_v0  ;;  %v1680_v58 = vadd.f32 %v1155_v27, %v3979_v43 }
 0x2b6   : > { %v2090_v34 = vadd.f32 %v2074_v10, %v2058_v26  ;;  %v1995_v33 = vmul.f32 %v1490_v32, %v3681_v24  ;;  %v1230_v55 = vadd.f32 %v3991_v13, %v1229_v3  ;;  %v1816_v53 = vadd.f32 %v4167_v15, %v1815_v23 }
 0x2b7   : > { %v1810_v56 = vsel %vm1807_vm13, %v1809_v18, %v1805_v31  ;;  %vm1818_vm14 = vweird.f32 %v4167_v15  ;;  %v1821_v1 = vand.u32 2147483647, %v4118_v6  ;;  %v2394_v21 = vmul.f32 -1.442695, %v1680_v58 }
 0x2b8   : > { %v1232_v51 = vpop.f32.mrf.mxu1  ;;  %2106 = vst [vmem:[%s2919_s15 + $0x10] sm:$0xff] %v2090_v34  ;;  %v2011_v28 = vadd.f32 %v1995_v33, %v1227_v46  ;;  %vm4273_vm15 = vmor %vm1817_vm5, %vm1818_vm14  ;;  %v2012_v43 = vadd.f32 %v3765_v47, %v1230_v55  ;;  %v1158_v0 = vadd.f32 %v3694_v52, %v1157_v45  ;;  %v1845_v3 = vmul.f32 %v4219_v54, %v1844_v42 }
 0x2b9   : > { %vm1847_vm0 = vweird.f32 %v4169_v44  ;;  %v1853_v23 = vand.u32 2147483648, %v4169_v44  ;;  %v1820_v58 = vsel %vm4273_vm15, %v4167_v15, %v1816_v53  ;;  %v1233_v10 = vadd.f32 %v3991_v13, %v1232_v51  ;;  %v4797_v53 = vld [vmem:[#allocation4_spill] sm:$0xff] }
 0x2ba   : > { %v1160_v62 = vpop.f32.mrf.mxu0  ;;  %2652 = vtanh.f32 %v2011_v28  ;;  %v1681_v46 = vadd.f32 %v1158_v0, %v4128_v4  ;;  %v1831_v22 = vadd.f32 %v4177_v39, %v1830_v19  ;;  %vm1833_vm1 = vweird.f32 %v4177_v39 }
 0x2bb   : > { %v4289_v47 = vpop.eup %2650  ;;  %v2043_v45 = vsub.f32 1.0, %v1810_v56  ;;  %2654 = vpow2.f32 %v2394_v21  ;;  %vm1822_vm2 = vcmp.eq.f32.partialorder %v1821_v1, 8.507059e+37  ;;  %v1824_v42 = vor.u32 1.1754944e-38, %v1823_v60  ;;  %vm4299_vm3 = vmor %vm1832_vm11, %vm1833_vm1  ;;  %v1079_v60 = vpop.f32.mrf.mxu3 }
 0x2bc   : > { %v1858_v15 = vmul.f32 %v4289_v47, %v4244_v20  ;;  %2656 = vtanh.f32 %v2012_v43  ;;  %v2395_v5 = vmul.f32 -1.442695, %v1681_v46  ;;  %v1836_v27 = vand.u32 2147483647, %v4124_v14 }
 0x2bd   : > { %v2075_v4 = vmul.f32 %v1810_v56, %v3317_v30  ;;  %v1825_v19 = vsel %vm1822_vm2, %v1824_v42, %v1820_v58  ;;  %v2013_v50 = vadd.f32 %v3835_v59, %v1233_v10  ;;  %v1161_v6 = vadd.f32 %v3694_v52, %v1160_v62 }
 0x2be   : > { %v1859_v31 = vsub.f32 1.0, %v1858_v15  ;;  %2658 = vpow2.f32 %v2395_v5  ;;  %v1835_v32 = vsel %vm4299_vm3, %v4177_v39, %v1831_v22  ;;  %v1839_v30 = vor.u32 1.1754944e-38, %v1838_v63 }
 0x2bf   : > { %vm1603_vm4 = vweird.f32 %v4073_v7  ;;  %2660 = vtanh.f32 %v2013_v50  ;;  %v1682_v18 = vadd.f32 %v1161_v6, %v4150_v35  ;;  %v1846_v59 = vadd.f32 %v4219_v54, %v1845_v3 }
 0x2c0   : > { %v1235_v34 = vpop.f32.mrf.mxu1  ;;  %vm1848_vm5 = vweird.f32 %v4219_v54  ;;  %v2653_v55 = vpop.eup %2652  ;;  %v2044_v56 = vsub.f32 1.0, %v1825_v19  ;;  %v2076_v1 = vmul.f32 %v1825_v19, %v4797_v53  ;;  %vm1837_vm6 = vcmp.eq.f32.partialorder %v1836_v27, 8.507059e+37  ;;  %v4800_v27 = vld [vmem:[#allocation5_spill] sm:$0xff] }
 0x2c1   : > { %v1236_v39 = vadd.f32 %v3991_v13, %v1235_v34  ;;  %v2655_v14 = vpop.eup %2654  ;;  %vm1602_vm7 = vweird.f32 %v4004_v16  ;;  %v2059_v63 = vmul.f32 %v2653_v55, %v2043_v45  ;;  %v1840_v51 = vsel %vm1837_vm6, %v1839_v30, %v1835_v32  ;;  %vm4325_vm8 = vmor %vm1847_vm0, %vm1848_vm5  ;;  %v4358_v55 = vld [vmem:[%s4723_s7 + $0x1] ss:$0 sm:$0xff] }
 0x2c2   : > { %v1163_v33 = vpop.f32.mrf.mxu0  ;;  %v2396_v62 = vmul.f32 -1.442695, %v1682_v18  ;;  %v1851_v35 = vand.u32 2147483647, %v4169_v44  ;;  %v2657_v28 = vpop.eup %2656  ;;  %v1860_v21 = vmul.f32 %v4289_v47, %v1859_v31  ;;  %v4319_v24 = vadd.f32 1.0, %v2655_v14  ;;  %vm4367_vm12 = vmor %vm1602_vm7, %vm1603_vm4 }
 0x2c3   : > { %v2014_v0 = vadd.f32 %v3866_v48, %v1236_v39  ;;  %v1164_v3 = vadd.f32 %v3694_v52, %v1163_v33  ;;  %v2091_v58 = vadd.f32 %v2075_v4, %v2059_v63  ;;  %v2060_v10 = vmul.f32 %v2657_v28, %v2044_v56  ;;  %v4337_v44 = vld [vmem:[%s4722_s6 + $0x1] ss:$0 sm:$0xff] }
 0x2c4   : > { %2662 = vpow2.f32 %v2396_v62  ;;  %v1850_v46 = vsel %vm4325_vm8, %v4219_v54, %v1846_v59  ;;  %v2659_v22 = vpop.eup %2658  ;;  %v1077_v45 = vadd.f32 %v4337_v44, %v4256_v29  ;;  %v2045_v52 = vsub.f32 1.0, %v1840_v51  ;;  %v1082_v59 = vpop.f32.mrf.mxu3 }
 0x2c5   : > { %2664 = vrcp.f32 %v4319_v24  ;;  %v1854_v48 = vor.u32 1.1754944e-38, %v1853_v23  ;;  %v2661_v42 = vpop.eup %2660  ;;  %2107 = vst [vmem:[%s2919_s15 + $0x18] sm:$0xff] %v2091_v58  ;;  %v2092_v15 = vadd.f32 %v2076_v1, %v2060_v10  ;;  %v4343_v5 = vadd.f32 1.0, %v2659_v22 }
 0x2c6   : > { %vm1852_vm9 = vcmp.eq.f32.partialorder %v1851_v35, 8.507059e+37  ;;  %2666 = vtanh.f32 %v2014_v0  ;;  %v2061_v54 = vmul.f32 %v2661_v42, %v2045_v52  ;;  %v2077_v4 = vmul.f32 %v1840_v51, %v4800_v27 }
 0x2c7   : > { %v1855_v19 = vsel %vm1852_vm9, %v1854_v48, %v1850_v46  ;;  %v1683_v26 = vadd.f32 %v1164_v3, %v1077_v45  ;;  %v1614_v50 = vsub.f32 1.0, %v4181_v61  ;;  %v1080_v29 = vadd.f32 %v4337_v44, %v1079_v60  ;;  %2108 = vst [vmem:[%s2919_s15 + $0x20] sm:$0xff] %v2092_v15 }
 0x2c8   : > { %2668 = vrcp.f32 %v4343_v5  ;;  %v1238_v23 = vpop.f32.mrf.mxu1  ;;  %v1861_v6 = vadd.f32 %v4289_v47, %v1860_v21  ;;  %v2093_v32 = vadd.f32 %v2077_v4, %v2061_v54  ;;  %vm1863_vm10 = vweird.f32 %v4289_v47 }
 0x2c9   : > { %v2397_v30 = vmul.f32 -1.442695, %v1683_v26  ;;  %v1239_v18 = vadd.f32 %v3991_v13, %v1238_v23  ;;  %vm1862_vm11 = vweird.f32 %v4244_v20  ;;  %v1868_v60 = vand.u32 2147483648, %v4244_v20 }
 0x2ca   : > { %v1166_v31 = vpop.f32.mrf.mxu0  ;;  %v2663_v34 = vpop.eup %2662  ;;  %v2046_v33 = vsub.f32 1.0, %v1855_v19  ;;  %2109 = vst [vmem:[%s2919_s15 + $0x28] sm:$0xff] %v2093_v32  ;;  %v1866_v14 = vand.u32 2147483647, %v4244_v20  ;;  %v1605_v62 = vsel %vm4367_vm12, %v4073_v7, %v4207_v36  ;;  %v2385_v35 = vmul.f32 -1.442695, %v3973_v38  ;;  %vm4387_vm13 = vmor %vm1862_vm11, %vm1863_vm10 }
 0x2cb   : > { %v1167_v56 = vadd.f32 %v4358_v55, %v1166_v31  ;;  %v4361_v53 = vpop.eup %2664  ;;  %v4372_v39 = vadd.f32 1.0, %v2663_v34  ;;  %2670 = vpow2.f32 %v2397_v30  ;;  %v2015_v63 = vadd.f32 %v3940_v49, %v1239_v18  ;;  %v4807_v7 = vld [vmem:[#allocation6_spill] sm:$0xff] }
 0x2cc   : > { %v2667_v51 = vpop.eup %2666  ;;  %v1873_v28 = vmul.f32 %v4361_v53, %v4319_v24  ;;  %vm4393_vm14 = vcmp.eq.f32.partialorder %v1606_v25, 8.507059e+37  ;;  %v2078_v36 = vmul.f32 %v1855_v19, %v4807_v7  ;;  %v1865_v20 = vsel %vm4387_vm13, %v4289_v47, %v1861_v6  ;;  %v1085_v18 = vpop.f32.mrf.mxu3 }
 0x2cd   : > { %v1684_v49 = vadd.f32 %v1167_v56, %v1080_v29  ;;  %2672 = vrcp.f32 %v4372_v39  ;;  %v2062_v38 = vmul.f32 %v2667_v51, %v2046_v33  ;;  %v1883_v58 = vand.u32 2147483648, %v4319_v24 }
 0x2ce   : > { %v4402_v0 = vpop.eup %2668  ;;  %v1874_v3 = vsub.f32 1.0, %v1873_v28  ;;  %v1869_v16 = vor.u32 1.1754944e-38, %v1868_v60  ;;  %2674 = vtanh.f32 %v2015_v63  ;;  %vm1867_vm15 = vcmp.eq.f32.partialorder %v1866_v14, 8.507059e+37  ;;  %v4808_v60 = vld [vmem:[#allocation7_spill] sm:$0xff] }
 0x2cf   : > { %v1888_v25 = vmul.f32 %v4402_v0, %v4343_v5  ;;  %v2094_v10 = vadd.f32 %v2078_v36, %v2062_v38  ;;  %v2398_v46 = vmul.f32 -1.442695, %v1684_v49  ;;  %v1083_v22 = vadd.f32 %v4337_v44, %v1082_v59 }
 0x2d0   : > { %v1875_v45 = vmul.f32 %v4361_v53, %v1874_v3  ;;  %v1870_v52 = vsel %vm1867_vm15, %v1869_v16, %v1865_v20  ;;  %v1241_v47 = vpop.f32.mrf.mxu1  ;;  %vm1878_vm0 = vweird.f32 %v4361_v53  ;;  %vm1877_vm1 = vweird.f32 %v4319_v24 }
 0x2d1   : > { %v2671_v42 = vpop.eup %2670  ;;  %v1889_v15 = vsub.f32 1.0, %v1888_v25  ;;  %2110 = vst [vmem:[%s2919_s15 + $0x30] sm:$0xff] %v2094_v10  ;;  %2676 = vpow2.f32 %v2398_v46  ;;  %v1242_v54 = vadd.f32 %v3991_v13, %v1241_v47  ;;  %v1881_v26 = vand.u32 2147483647, %v4319_v24  ;;  %vm1879_vm2 = vmor %vm1877_vm1, %vm1878_vm0 }
 0x2d2   : > { %v1169_v48 = vpop.f32.mrf.mxu0  ;;  %v4414_v4 = vadd.f32 1.0, %v2671_v42  ;;  %v1876_v19 = vadd.f32 %v4361_v53, %v1875_v45  ;;  %v2047_v23 = vsub.f32 1.0, %v1870_v52  ;;  %v1884_v6 = vor.u32 1.1754944e-38, %v1883_v58  ;;  %v4809_v58 = vld [vmem:[#allocation8_spill] sm:$0xff] }
 0x2d3   : > { %v1170_v27 = vadd.f32 %v4358_v55, %v1169_v48  ;;  %v4418_v29 = vpop.eup %2672  ;;  %v2016_v31 = vadd.f32 %v3999_v41, %v1242_v54  ;;  %v1890_v34 = vmul.f32 %v4402_v0, %v1889_v15  ;;  %v2079_v33 = vmul.f32 %v1870_v52, %v4808_v60 }
 0x2d4   : > { %v2675_v30 = vpop.eup %2674  ;;  %v1903_v59 = vmul.f32 %v4418_v29, %v4372_v39  ;;  %2678 = vrcp.f32 %v4414_v4  ;;  %v1880_v41 = vsel %vm1879_vm2, %v4361_v53, %v1876_v19  ;;  %v1610_v14 = vsel %vm4393_vm14, %v4142_v12, %v1605_v62 }
 0x2d5   : > { %v1685_v32 = vadd.f32 %v1170_v27, %v1083_v22  ;;  %v2063_v56 = vmul.f32 %v2675_v30, %v2047_v23  ;;  %2680 = vtanh.f32 %v2016_v31  ;;  %v1615_v63 = vmul.f32 %v4158_v8, %v1614_v50 }
 0x2d6   : > { %2682 = vpow2.f32 %v2385_v35  ;;  %vm1882_vm3 = vcmp.eq.f32.partialorder %v1881_v26, 8.507059e+37  ;;  %v4438_v24 = vadd.f32 1.0, %v4199_v9  ;;  %v1904_v53 = vsub.f32 1.0, %v1903_v59  ;;  %v1088_v26 = vpop.f32.mrf.mxu3 }
 0x2d7   : > { %v2399_v1 = vmul.f32 -1.442695, %v1685_v32  ;;  %v2677_v51 = vpop.eup %2676  ;;  %v2095_v28 = vadd.f32 %v2079_v33, %v2063_v56  ;;  %v1885_v21 = vsel %vm1882_vm3, %v1884_v6, %v1880_v41  ;;  %v1891_v12 = vadd.f32 %v4402_v0, %v1890_v34  ;;  %v1340_v41 = vpop.f32.mrf.mxu2 }
 0x2d8   : > { %v4440_v49 = vadd.f32 1.0, %v2677_v51  ;;  %v1244_v38 = vpop.f32.mrf.mxu1  ;;  %vm1893_vm4 = vweird.f32 %v4402_v0  ;;  %v1086_v62 = vadd.f32 %v4337_v44, %v1085_v18  ;;  %v1898_v50 = vand.u32 2147483648, %v4343_v5 }
 0x2d9   : > { %2684 = vpow2.f32 %v2399_v1  ;;  %2111 = vst [vmem:[%s2919_s15 + $0x38] sm:$0xff] %v2095_v28  ;;  %v1245_v9 = vadd.f32 %v3991_v13, %v1244_v38  ;;  %v1628_v7 = vmul.f32 %v4228_v2, %v4163_v17  ;;  %vm1892_vm5 = vweird.f32 %v4343_v5  ;;  %v4813_v28 = vld [vmem:[#allocation9_spill] sm:$0xff] }
 0x2da   : > { %v1172_v61 = vpop.f32.mrf.mxu0  ;;  %v4449_v43 = vpop.eup %2678  ;;  %v2048_v36 = vsub.f32 1.0, %v1885_v21  ;;  %v1896_v20 = vand.u32 2147483647, %v4343_v5  ;;  %2686 = vrcp.f32 %v4440_v49  ;;  %v2080_v16 = vmul.f32 %v1885_v21, %v4809_v58  ;;  %vm4459_vm6 = vmor %vm1892_vm5, %vm1893_vm4 }
 0x2db   : > { %v1173_v35 = vadd.f32 %v4358_v55, %v1172_v61  ;;  %v2681_v3 = vpop.eup %2680  ;;  %v2017_v10 = vadd.f32 %v4134_v37, %v1245_v9  ;;  %vm1618_vm7 = vweird.f32 %v4158_v8  ;;  %v1905_v45 = vmul.f32 %v4418_v29, %v1904_v53 }
 0x2dc   : > { %v2683_v22 = vpop.eup %2682  ;;  %v1918_v5 = vmul.f32 %v4449_v43, %v4414_v4  ;;  %v2064_v52 = vmul.f32 %v2681_v3, %v2048_v36  ;;  %v1895_v47 = vsel %vm4459_vm6, %v4402_v0, %v1891_v12  ;;  %v4812_v42 = vand.u32 2147483648, %v4080_v40 }
 0x2dd   : > { %v1686_v46 = vadd.f32 %v1173_v35, %v1086_v62  ;;  %v1899_v37 = vor.u32 1.1754944e-38, %v1898_v50  ;;  %2688 = vtanh.f32 %v2017_v10  ;;  %v4476_v27 = vmul.f32 %v1610_v14, %v4131_v57 }
 0x2de   : > { %v4473_v15 = vor.u32 1.1754944e-38, %v4812_v42  ;;  %vm1617_vm8 = vweird.f32 %v4080_v40  ;;  %v1629_v19 = vsub.f32 1.0, %v1628_v7  ;;  %v2096_v23 = vadd.f32 %v2080_v16, %v2064_v52 }
 0x2df   : > { %v2685_v48 = vpop.eup %2684  ;;  %v2400_v54 = vmul.f32 -1.442695, %v1686_v46  ;;  %vm1897_vm9 = vcmp.eq.f32.partialorder %v1896_v20, 8.507059e+37  ;;  %v4480_v0 = vadd.f32 %v4158_v8, %v1615_v63  ;;  %v1919_v32 = vsub.f32 1.0, %v1918_v5  ;;  %vm4528_vm0 = vmor %vm1617_vm8, %vm1618_vm7 }
 0x2e0   : > { %v4482_v6 = vadd.f32 1.0, %v2685_v48  ;;  %v1900_v31 = vsel %vm1897_vm9, %v1899_v37, %v1895_v47  ;;  %2112 = vst [vmem:[%s2919_s15 + $0x40] sm:$0xff] %v2096_v23  ;;  %v1247_v30 = vpop.f32.mrf.mxu1  ;;  %v1906_v57 = vadd.f32 %v4418_v29, %v1905_v45  ;;  %vm1908_vm10 = vweird.f32 %v4418_v29  ;;  %v4488_v34 = vpop.eup %2686 }
 0x2e1   : > { %2690 = vpow2.f32 %v2400_v54  ;;  %v1089_v59 = vadd.f32 %v4337_v44, %v1088_v26  ;;  %v1913_v60 = vand.u32 2147483648, %v4372_v39  ;;  %v1248_v33 = vadd.f32 %v3991_v13, %v1247_v30  ;;  %v4821_v54 = vld [vmem:[#allocation10_spill] sm:$0xff]  ;;  %v1343_v23 = vpop.f32.mrf.mxu2 }
 0x2e2   : > { %2692 = vrcp.f32 %v4438_v24  ;;  %v1175_v18 = vpop.f32.mrf.mxu0  ;;  %v1630_v1 = vmul.f32 %v4228_v2, %v1629_v19  ;;  %vm1907_vm11 = vweird.f32 %v4372_v39  ;;  %v2049_v14 = vsub.f32 1.0, %v1900_v31 }
 0x2e3   : > { %v1176_v56 = vadd.f32 %v4358_v55, %v1175_v18  ;;  %v1911_v63 = vand.u32 2147483647, %v4372_v39  ;;  %v2689_v51 = vpop.eup %2688  ;;  %2694 = vrcp.f32 %v4482_v6  ;;  %v2081_v21 = vmul.f32 %v1900_v31, %v4813_v28  ;;  %vm4501_vm12 = vmor %vm1907_vm11, %vm1908_vm10 }
 0x2e4   : > { %v2018_v55 = vadd.f32 %v4140_v11, %v1248_v33  ;;  %v4816_v38 = vand.u32 2147483647, %v4080_v40  ;;  %v1920_v39 = vmul.f32 %v4449_v43, %v1919_v32  ;;  %v1933_v61 = vmul.f32 %v4488_v34, %v4440_v49 }
 0x2e5   : > { %v1687_v53 = vadd.f32 %v1176_v56, %v1089_v59  ;;  %v2065_v62 = vmul.f32 %v2689_v51, %v2049_v14  ;;  %v1910_v50 = vsel %vm4501_vm12, %v4418_v29, %v1906_v57  ;;  %v4518_v35 = vadd.f32 1.0, %v2683_v22  ;;  %v4569_v57 = vld [vmem:[%s4723_s7 + $0x2] ss:$0 sm:$0xff] }
 0x2e6   : > { %vm4508_vm13 = vcmp.eq.f32.partialorder %v4816_v38, 8.507059e+37  ;;  %v1914_v11 = vor.u32 1.1754944e-38, %v1913_v60  ;;  %2696 = vtanh.f32 %v2018_v55  ;;  %vm1632_vm14 = vweird.f32 %v4163_v17 }
 0x2e7   : > { %v2691_v9 = vpop.eup %2690  ;;  %v2401_v7 = vmul.f32 -1.442695, %v1687_v53  ;;  %v1636_v20 = vand.u32 2147483647, %v4163_v17  ;;  %v2097_v3 = vadd.f32 %v2081_v21, %v2065_v62  ;;  %vm1912_vm15 = vcmp.eq.f32.partialorder %v1911_v63, 8.507059e+37 }
 0x2e8   : > { %v4520_v36 = vpop.eup %2692  ;;  %vm1633_vm1 = vweird.f32 %v4228_v2  ;;  %v4533_v58 = vadd.f32 1.0, %v2691_v9  ;;  %v1915_v16 = vsel %vm1912_vm15, %v1914_v11, %v1910_v50  ;;  %v1620_v25 = vsel %vm4528_vm0, %v4158_v8, %v4480_v0  ;;  %v1250_v46 = vpop.f32.mrf.mxu1  ;;  %v4600_v53 = vld [vmem:[%s4722_s6 + $0x2] ss:$0 sm:$0xff]  ;;  %v4826_v9 = vld [vmem:[#allocation11_spill] sm:$0xff] }
 0x2e9   : > { %2698 = vpow2.f32 %v2401_v7  ;;  %v1934_v10 = vsub.f32 1.0, %v1933_v61  ;;  %2113 = vst [vmem:[%s2919_s15 + $0x48] sm:$0xff] %v2097_v3  ;;  %v1921_v40 = vadd.f32 %v4449_v43, %v1920_v39  ;;  %vm1923_vm2 = vweird.f32 %v4449_v43  ;;  %v4542_v22 = vpop.eup %2694  ;;  %vm4579_vm5 = vmor %vm1632_vm14, %vm1633_vm1 }
 0x2ea   : > { %2700 = vrcp.f32 %v4518_v35  ;;  %v1631_v45 = vadd.f32 %v4228_v2, %v1630_v1  ;;  %v1928_v5 = vand.u32 2147483648, %v4414_v4  ;;  %v1251_v52 = vadd.f32 %v3991_v13, %v1250_v46  ;;  %v1346_v46 = vpop.f32.mrf.mxu2 }
 0x2eb   : > { %v1643_v8 = vmul.f32 %v4520_v36, %v4438_v24  ;;  %vm1922_vm3 = vweird.f32 %v4414_v4  ;;  %v2050_v47 = vsub.f32 1.0, %v1915_v16  ;;  %v1926_v48 = vand.u32 2147483647, %v4414_v4 }
 0x2ec   : > { %v2697_v42 = vpop.eup %2696  ;;  %v1638_v37 = vand.u32 2147483648, %v4163_v17  ;;  %2702 = vrcp.f32 %v4533_v58  ;;  %v2082_v19 = vmul.f32 %v1915_v16, %v4821_v54  ;;  %vm4555_vm4 = vmor %vm1922_vm3, %vm1923_vm2  ;;  %v2019_v13 = vadd.f32 %v4476_v27, %v1251_v52 }
 0x2ed   : > { %v1935_v0 = vmul.f32 %v4488_v34, %v1934_v10  ;;  %v1948_v31 = vmul.f32 %v4542_v22, %v4482_v6  ;;  %v2066_v4 = vmul.f32 %v2697_v42, %v2050_v47  ;;  %v1925_v32 = vsel %vm4555_vm4, %v4449_v43, %v1921_v40 }
 0x2ee   : > { %v1341_v18 = vadd.f32 %v4569_v57, %v1340_v41  ;;  %v1625_v27 = vsel %vm4508_vm13, %v4473_v15, %v1620_v25  ;;  %v1929_v43 = vor.u32 1.1754944e-38, %v1928_v5  ;;  %2704 = vtanh.f32 %v2019_v13 }
 0x2ef   : > { %v2699_v30 = vpop.eup %2698  ;;  %v1635_v60 = vsel %vm4579_vm5, %v4228_v2, %v1631_v45  ;;  %v1644_v33 = vsub.f32 1.0, %v1643_v8  ;;  %v2098_v56 = vadd.f32 %v2082_v19, %v2066_v4  ;;  %vm1927_vm6 = vcmp.eq.f32.partialorder %v1926_v48, 8.507059e+37 }
 0x2f0   : > { %v4586_v41 = vpop.eup %2700  ;;  %v1344_v15 = vadd.f32 %v4569_v57, %v1343_v23  ;;  %v1639_v1 = vor.u32 1.1754944e-38, %v1638_v37  ;;  %v4589_v14 = vadd.f32 1.0, %v2699_v30  ;;  %v1930_v17 = vsel %vm1927_vm6, %v1929_v43, %v1925_v32  ;;  %v1253_v51 = vpop.f32.mrf.mxu1 }
 0x2f1   : > { %vm1637_vm7 = vcmp.eq.f32.partialorder %v1636_v20, 8.507059e+37  ;;  %v1949_v63 = vsub.f32 1.0, %v1948_v31  ;;  %2114 = vst [vmem:[%s2919_s15 + $0x50] sm:$0xff] %v2098_v56  ;;  %v1936_v28 = vadd.f32 %v4488_v34, %v1935_v0  ;;  %vm1938_vm8 = vweird.f32 %v4488_v34 }
 0x2f2   : > { %v4594_v2 = vpop.eup %2702  ;;  %v2004_v21 = vmul.f32 %v1625_v27, %v1341_v18  ;;  %v1640_v44 = vsel %vm1637_vm7, %v1639_v1, %v1635_v60  ;;  %v1943_v55 = vand.u32 2147483648, %v4440_v49  ;;  %v1254_v38 = vadd.f32 %v4600_v53, %v1253_v51  ;;  %v4833_v18 = vld [vmem:[#allocation12_spill] sm:$0xff] }
 0x2f3   : > { %v1645_v12 = vmul.f32 %v4520_v36, %v1644_v33  ;;  %vm1937_vm9 = vweird.f32 %v4440_v49  ;;  %v2051_v39 = vsub.f32 1.0, %v1930_v17  ;;  %v1941_v61 = vand.u32 2147483647, %v4440_v49 }
 0x2f4   : > { %v2705_v62 = vpop.eup %2704  ;;  %v1658_v50 = vmul.f32 %v4586_v41, %v4518_v35  ;;  %2706 = vrcp.f32 %v4589_v14  ;;  %v2083_v11 = vmul.f32 %v1930_v17, %v4826_v9  ;;  %vm4612_vm10 = vmor %vm1937_vm9, %vm1938_vm8  ;;  %v2020_v20 = vadd.f32 %v2004_v21, %v1254_v38 }
 0x2f5   : > { %v1950_v3 = vmul.f32 %v4542_v22, %v1949_v63  ;;  %v1963_v49 = vmul.f32 %v4594_v2, %v4533_v58  ;;  %v2067_v29 = vmul.f32 %v2705_v62, %v2051_v39  ;;  %v1940_v16 = vsel %vm4612_vm10, %v4488_v34, %v1936_v28 }
 0x2f6   : > { %v1651_v25 = vand.u32 2147483647, %v4438_v24  ;;  %v1944_v10 = vor.u32 1.1754944e-38, %v1943_v55  ;;  %2708 = vtanh.f32 %v2020_v20  ;;  %v1646_v40 = vadd.f32 %v4520_v36, %v1645_v12  ;;  %v1349_v12 = vpop.f32.mrf.mxu2 }
 0x2f7   : > { %vm1648_vm11 = vweird.f32 %v4520_v36  ;;  %v2099_v45 = vadd.f32 %v2083_v11, %v2067_v29  ;;  %vm1942_vm12 = vcmp.eq.f32.partialorder %v1941_v61, 8.507059e+37  ;;  %v2005_v5 = vmul.f32 %v1640_v44, %v1344_v15 }
 0x2f8   : > { %v1653_v52 = vand.u32 2147483648, %v4438_v24  ;;  %v1659_v8 = vsub.f32 1.0, %v1658_v50  ;;  %v1945_v47 = vsel %vm1942_vm12, %v1944_v10, %v1940_v16  ;;  %vm1647_vm13 = vweird.f32 %v4438_v24  ;;  %v1256_v34 = vpop.f32.mrf.mxu1 }
 0x2f9   : > { %v1964_v48 = vsub.f32 1.0, %v1963_v49  ;;  %2115 = vst [vmem:[%s2919_s15 + $0x58] sm:$0xff] %v2099_v45  ;;  %v1951_v42 = vadd.f32 %v4542_v22, %v1950_v3  ;;  %vm1953_vm14 = vweird.f32 %v4542_v22  ;;  %v1347_v54 = vadd.f32 %v4569_v57, %v1346_v46  ;;  %vm4635_vm15 = vmor %vm1647_vm13, %vm1648_vm11  ;;  %v4836_v3 = vld [vmem:[#allocation13_spill] sm:$0xff] }
 0x2fa   : > { %v4630_v37 = vpop.eup %2706  ;;  %vm4639_vm0 = vcmp.eq.f32.partialorder %v1651_v25, 8.507059e+37  ;;  %v1958_v24 = vand.u32 2147483648, %v4482_v6  ;;  %v1257_v13 = vadd.f32 %v4600_v53, %v1256_v34  ;;  %v1650_v23 = vsel %vm4635_vm15, %v4520_v36, %v1646_v40  ;;  %v4837_v34 = vld [vmem:[#allocation14_spill] sm:$0xff] }
 0x2fb   : > { %vm1952_vm1 = vweird.f32 %v4482_v6  ;;  %v2052_v0 = vsub.f32 1.0, %v1945_v47  ;;  %v1956_v31 = vand.u32 2147483647, %v4482_v6  ;;  %v1654_v32 = vor.u32 1.1754944e-38, %v1653_v52 }
 0x2fc   : > { %v2709_v4 = vpop.eup %2708  ;;  %v1660_v30 = vmul.f32 %v4586_v41, %v1659_v8  ;;  %v2084_v27 = vmul.f32 %v1945_v47, %v4833_v18  ;;  %vm1954_vm2 = vmor %vm1952_vm1, %vm1953_vm14  ;;  %v2021_v59 = vadd.f32 %v2005_v5, %v1257_v13  ;;  %v1965_v43 = vmul.f32 %v4594_v2, %v1964_v48 }
 0x2fd   : > { %v1978_v36 = vmul.f32 %v4630_v37, %v4589_v14  ;;  %v2068_v60 = vmul.f32 %v2709_v4, %v2052_v0  ;;  %v1955_v33 = vsel %vm1954_vm2, %v4542_v22, %v1951_v42  ;;  %v1655_v6 = vsel %vm4639_vm0, %v1654_v32, %v1650_v23  ;;  %v4838_v0 = vld [vmem:[#allocation15_spill] sm:$0xff] }
 0x2fe   : > { %v1959_v56 = vor.u32 1.1754944e-38, %v1958_v24  ;;  %2710 = vtanh.f32 %v2021_v59  ;;  %vm1957_vm3 = vcmp.eq.f32.partialorder %v1956_v31, 8.507059e+37  ;;  %v1661_v1 = vadd.f32 %v4586_v41, %v1660_v30 }
 0x2ff   : > { %v2100_v15 = vadd.f32 %v2084_v27, %v2068_v60  ;;  %vm1663_vm4 = vweird.f32 %v4586_v41  ;;  %v1668_v17 = vand.u32 2147483648, %v4518_v35  ;;  %v2006_v51 = vmul.f32 %v1655_v6, %v1347_v54 }
 0x300   : > { %v1960_v63 = vsel %vm1957_vm3, %v1959_v56, %v1955_v33  ;;  %v1979_v28 = vsub.f32 1.0, %v1978_v36  ;;  %v1259_v21 = vpop.f32.mrf.mxu1  ;;  %v1966_v22 = vadd.f32 %v4594_v2, %v1965_v43  ;;  %vm1968_vm5 = vweird.f32 %v4594_v2 }
 0x301   : > { %2116 = vst [vmem:[%s2919_s15 + $0x60] sm:$0xff] %v2100_v15  ;;  %vm1662_vm6 = vweird.f32 %v4518_v35  ;;  %v1666_v44 = vand.u32 2147483647, %v4518_v35  ;;  %v1973_v55 = vand.u32 2147483648, %v4533_v58  ;;  %v1260_v38 = vadd.f32 %v4600_v53, %v1259_v21 }
 0x302   : > { %vm4670_vm7 = vmor %vm1662_vm6, %vm1663_vm4  ;;  %vm1967_vm8 = vweird.f32 %v4533_v58  ;;  %v2053_v61 = vsub.f32 1.0, %v1960_v63  ;;  %v1971_v62 = vand.u32 2147483647, %v4533_v58  ;;  %v1669_v35 = vor.u32 1.1754944e-38, %v1668_v17 }
 0x303   : > { %v1665_v9 = vsel %vm4670_vm7, %v4586_v41, %v1661_v1  ;;  %vm1969_vm9 = vmor %vm1967_vm8, %vm1968_vm5  ;;  %v2022_v11 = vadd.f32 %v2006_v51, %v1260_v38  ;;  %v1980_v7 = vmul.f32 %v4630_v37, %v1979_v28  ;;  %v2085_v49 = vmul.f32 %v1960_v63, %v4836_v3 }
 0x304   : > { %v2711_v50 = vpop.eup %2710  ;;  %v1970_v29 = vsel %vm1969_vm9, %v4594_v2, %v1966_v22  ;;  %v1350_v16 = vadd.f32 %v4569_v57, %v1349_v12  ;;  %vm1667_vm10 = vcmp.eq.f32.partialorder %v1666_v44, 8.507059e+37  ;;  %v1974_v58 = vor.u32 1.1754944e-38, %v1973_v55 }
 0x305   : > { %v2069_v20 = vmul.f32 %v2711_v50, %v2053_v61  ;;  %2712 = vtanh.f32 %v2022_v11  ;;  %v1670_v25 = vsel %vm1667_vm10, %v1669_v35, %v1665_v9  ;;  %vm1972_vm11 = vcmp.eq.f32.partialorder %v1971_v62, 8.507059e+37 }
 0x306   : > { %v1975_v41 = vsel %vm1972_vm11, %v1974_v58, %v1970_v29  ;;  %v1981_v40 = vadd.f32 %v4630_v37, %v1980_v7  ;;  %vm1983_vm12 = vweird.f32 %v4630_v37  ;;  %v2007_v45 = vmul.f32 %v1670_v25, %v1350_v16 }
 0x307   : > { %v2101_v10 = vadd.f32 %v2085_v49, %v2069_v20  ;;  %v1988_v5 = vand.u32 2147483648, %v4589_v14  ;;  %vm1982_vm13 = vweird.f32 %v4589_v14  ;;  %v2054_v57 = vsub.f32 1.0, %v1975_v41 }
 0x308   : > { %v1262_v46 = vpop.f32.mrf.mxu1  ;;  %v1986_v52 = vand.u32 2147483647, %v4589_v14  ;;  %vm1984_vm14 = vmor %vm1982_vm13, %vm1983_vm12  ;;  %v2086_v42 = vmul.f32 %v1975_v41, %v4837_v34 }
 0x309   : > { %2117 = vst [vmem:[%s2919_s15 + $0x68] sm:$0xff] %v2101_v10  ;;  %v1263_v2 = vadd.f32 %v4600_v53, %v1262_v46  ;;  %v1985_v54 = vsel %vm1984_vm14, %v4630_v37, %v1981_v40  ;;  %v1989_v19 = vor.u32 1.1754944e-38, %v1988_v5 }
 0x30a   : > { %vm1987_vm15 = vcmp.eq.f32.partialorder %v1986_v52, 8.507059e+37 }
 0x30b   : > { %v2713_v8 = vpop.eup %2712  ;;  %v2023_v47 = vadd.f32 %v2007_v45, %v1263_v2  ;;  %v1990_v24 = vsel %vm1987_vm15, %v1989_v19, %v1985_v54 }
 0x30c   : > { %v2070_v48 = vmul.f32 %v2713_v8, %v2054_v57  ;;  %v2055_v53 = vsub.f32 1.0, %v1990_v24  ;;  %v2087_v14 = vmul.f32 %v1990_v24, %v4838_v0 }
 0x30d   : > { %2714 = vtanh.f32 %v2023_v47 }
 0x30e   : > { %v2102_v26 = vadd.f32 %v2086_v42, %v2070_v48 }
 0x310   : > { %2118 = vst [vmem:[%s2919_s15 + $0x70] sm:$0xff] %v2102_v26 }
 0x313   : > { %v2715_v13 = vpop.eup %2714 }
 0x314   : > { %v2071_v23 = vmul.f32 %v2715_v13, %v2055_v53 }
 0x316   : > { %v2103_v31 = vadd.f32 %v2087_v14, %v2071_v23 }
 0x318   : > { %2119 = vst [vmem:[%s2919_s15 + $0x78] sm:$0xff] %v2103_v31 }
 0x319 PF: > { %s18_s11 = sadd.s32 1, %s2775_s11   ;;  %s4839_s27 = smov %s2755_s28 }
 0x31a   : > { %p15_p0 = scmp.ge.s32.totalorder %s18_s11, 6   ;;  %s4840_s28 = smov %s2874_s18 }
 0x31b   : > { %s4841_s29 = smov %s2767_s9  ;;  %s4842_s30 = smov %s2771_s10 }
 0x31c   : > { %s4843_s9 = smov %s4846_s12  ;;  %s4844_s10 = smov %s4850_s13 }
 0x31d   :  { %17 = sbr.rel (!%p15_p0) target bundleno = 6 (0x6), region = 150 }

</bundles_post_ra>
